<compile_context>
chip_gen: v7x
topology: tpu7x:2x2x1
jax: 0.10.0
libtpu: 0.0.40
codegen_flags: <defaults>
</compile_context>

<pallas_src>
import functools

import jax
import jax.numpy as jnp
from jax.experimental import pallas as pl
from jax.experimental.pallas import tpu as pltpu

LANE = 128          # TPU lane width: per-gate / per-feature padding.
G4 = 4 * LANE       # gate-major LSTM width (i, f, g, o each padded to 128).


def _round_up(x, m):
    return ((x + m - 1) // m) * m


def slab_layout(human_dim):
    """Static row layout of the packed weight slab (all offsets % 8 == 0)."""
    d_pad = _round_up(human_dim, 8)
    off_wih = 0                      # [d_pad, 512]   x -> gates projection
    off_whh = off_wih + d_pad        # [128, 512]     h -> gates projection
    off_bl = off_whh + LANE          # [1, 512]       combined LSTM bias (row 0 of 8)
    off_mlp = off_bl + 8             # [128, 512]     cols 0:128=w1, 128:256=w2, 256:384=wn
    off_b = off_mlp + LANE           # [1, 512]       cols 0:128=b1, 128:256=b2, 256:384=bn
    rows = off_b + 8
    return dict(d_pad=d_pad, off_wih=off_wih, off_whh=off_whh, off_bl=off_bl,
                off_mlp=off_mlp, off_b=off_b, rows=rows)


# ---------------------------------------------------------------------------
# Fused kernel: one batch tile through the whole forward.
# ---------------------------------------------------------------------------
def dqfunc_fused_kernel(hs_ref, side_ref, slab_ref, q_ref, *,
                        seq_len, d_pad, off_whh, off_bl, off_mlp, off_b):
    # --- static, tile-aligned views into the packed weight slab ------------
    w_ih = slab_ref[0:d_pad, :]                              # [d_pad, 512]
    w_hh = slab_ref[off_whh:off_whh + LANE, :]               # [128, 512]
    b_l = slab_ref[off_bl:off_bl + 1, :]                     # [1, 512]
    w1 = slab_ref[off_mlp:off_mlp + LANE, 0:LANE]            # [128, 128]
    w2 = slab_ref[off_mlp:off_mlp + LANE, LANE:2 * LANE]     # [128, 128]
    wn = slab_ref[off_mlp:off_mlp + LANE, 2 * LANE:3 * LANE]  # [128, 128]
    b1 = slab_ref[off_b:off_b + 1, 0:LANE]                   # [1, 128]
    b2 = slab_ref[off_b:off_b + 1, LANE:2 * LANE]            # [1, 128]
    bn = slab_ref[off_b:off_b + 1, 2 * LANE:3 * LANE]        # [1, 128]

    tb = side_ref.shape[0]  # batch tile (multiple of 8 sublanes)

    # Input projections for every step are independent of the recurrence
    # state; emitting them up-front lets the scheduler overlap them with the
    # serial h -> gates chain (only h @ w_hh + gate math is on the critical
    # path).
    gx = [jnp.dot(hs_ref[t], w_ih, preferred_element_type=jnp.float32) + b_l
          for t in range(seq_len)]

    # --- statically-unrolled LSTM recurrence --------------------------------
    h = jnp.zeros((tb, LANE), jnp.float32)
    c = jnp.zeros((tb, LANE), jnp.float32)
    for t in range(seq_len):
        g = gx[t] + jnp.dot(h, w_hh, preferred_element_type=jnp.float32)
        i_g = jax.nn.sigmoid(g[:, 0 * LANE:1 * LANE])
        f_g = jax.nn.sigmoid(g[:, 1 * LANE:2 * LANE])
        g_g = jnp.tanh(g[:, 2 * LANE:3 * LANE])
        o_g = jax.nn.sigmoid(g[:, 3 * LANE:4 * LANE])
        c = f_g * c + i_g * g_g
        h = o_g * jnp.tanh(c)
    # Pad lanes [H:128] of h are exactly 0 every step (zero pad weights/bias
    # -> i=f=o=0.5, g=0 -> c_pad=h_pad=0), so adding the side features (which
    # live only in lanes H:H+sdim+adim) reconstructs cat([hn, self, action]).

    # --- MLP head + fused twin-Q heads, all lane-dense [tb, 128] -----------
    z = h + side_ref[...]
    h1 = jnp.maximum(
        jnp.dot(z, w1, preferred_element_type=jnp.float32) + b1, 0.0)
    h2 = jnp.maximum(
        jnp.dot(h1, w2, preferred_element_type=jnp.float32) + b2, 0.0)
    q_ref[...] = jnp.dot(h2, wn, preferred_element_type=jnp.float32) + bn


# ---------------------------------------------------------------------------
# Wrapper: one pallas_call, batch tiled by a 1-D "parallel" grid.
# ---------------------------------------------------------------------------
@functools.partial(jax.jit, static_argnames=("self_state_dim", "action_dim",
                                             "lstm_hidden_dim"))
def dqfunc_forward(slab, state, action, *, self_state_dim, action_dim,
                   lstm_hidden_dim):
    B, T, full_dim = state.shape
    human_dim = full_dim - self_state_dim
    H = lstm_hidden_dim
    lay = slab_layout(human_dim)
    d_pad = lay["d_pad"]

    # Batch tile: multiple of 8 sublanes, capped at 256 MXU rows.
    tb = min(256, _round_up(B, 8))
    b_pad = _round_up(B, tb)

    self_state = state[:, 0, :self_state_dim].astype(jnp.float32)   # [B, sdim]
    human = state[:, :, self_state_dim:].astype(jnp.float32)        # [B, T, D]
    human_tm = jnp.transpose(human, (1, 0, 2))                      # [T, B, D]
    human_tm = jnp.pad(human_tm,
                       ((0, 0), (0, b_pad - B), (0, d_pad - human_dim)))

    action2 = action.reshape(-1, action_dim).astype(jnp.float32)    # [B, adim]
    # One lane-dense "side features" operand replacing the cat() tail.
    side = jnp.zeros((b_pad, LANE), jnp.float32)
    side = side.at[:B, H:H + self_state_dim].set(self_state)
    side = side.at[:B, H + self_state_dim:
                   H + self_state_dim + action_dim].set(action2)

    kernel = functools.partial(
        dqfunc_fused_kernel, seq_len=T, d_pad=d_pad,
        off_whh=lay["off_whh"], off_bl=lay["off_bl"],
        off_mlp=lay["off_mlp"], off_b=lay["off_b"])

    q = pl.pallas_call(
        kernel,
        out_shape=jax.ShapeDtypeStruct((b_pad, LANE), jnp.float32),
        grid=(b_pad // tb,),
        in_specs=[
            # per-tile human states, time-major
            pl.BlockSpec((T, tb, d_pad), lambda i: (0, i, 0)),
            # per-tile side features (self_state + action lanes)
            pl.BlockSpec((tb, LANE), lambda i: (i, 0)),
            # packed weight slab: constant index_map -> fetched once,
            # VMEM-resident across all grid steps.
            pl.BlockSpec((lay["rows"], G4), lambda i: (0, 0)),
        ],
        out_specs=pl.BlockSpec((tb, LANE), lambda i: (i, 0)),
        compiler_params=pltpu.CompilerParams(
            dimension_semantics=("parallel",)),
    )(human_tm, side, slab)

    return q[:B, 0:1], q[:B, 1:2]


# ---------------------------------------------------------------------------
# Parameters: raw (PyTorch-shaped, transposed for x@W) + packed slab.
# ---------------------------------------------------------------------------
def init_raw_params(key, human_dim, action_dim, hidden_size, lstm_hidden_dim,
                    self_state_dim):
    ks = jax.random.split(key, 12)
    H = lstm_hidden_dim
    in_dim = action_dim + lstm_hidden_dim + self_state_dim

    def unif(k, shape, bound):
        return jax.random.uniform(k, shape, jnp.float32, -bound, bound)

    lstm_b = 1.0 / jnp.sqrt(H)
    l1_b = 1.0 / jnp.sqrt(in_dim)
    l2_b = 1.0 / jnp.sqrt(hidden_size)

    return {
        # LSTM weights transposed: x @ w_ih, h @ w_hh (gate order i,f,g,o)
        "w_ih": unif(ks[0], (human_dim, 4 * H), lstm_b),
        "w_hh": unif(ks[1], (H, 4 * H), lstm_b),
        "b_lstm": unif(ks[2], (1, 4 * H), lstm_b) + unif(ks[3], (1, 4 * H), lstm_b),
        # linear1 over cat([hn, self_state, action]) (rows in that order)
        "w1": unif(ks[4], (in_dim, hidden_size), l1_b),
        "b1": unif(ks[5], (1, hidden_size), l1_b),
        "w2": unif(ks[6], (hidden_size, hidden_size), l2_b),
        "b2": unif(ks[7], (1, hidden_size), l2_b),
        "wn1": unif(ks[8], (hidden_size, 1), l2_b),
        "bn1": unif(ks[9], (1, 1), l2_b),
        "wn2": unif(ks[10], (hidden_size, 1), l2_b),
        "bn2": unif(ks[11], (1, 1), l2_b),
    }


def pack_params(raw, *, human_dim, hidden_size, lstm_hidden_dim,
                self_state_dim, action_dim):
    """Build the single pre-padded f32 weight slab [rows, 512]."""
    H = lstm_hidden_dim
    hid = hidden_size
    in_dim = H + self_state_dim + action_dim
    assert H <= LANE and hid <= LANE and in_dim <= LANE
    lay = slab_layout(human_dim)

    def pad_gate_cols(w):  # [..., 4H] -> [..., 512], each gate padded H->128
        out = jnp.zeros(w.shape[:-1] + (G4,), jnp.float32)
        for g in range(4):
            out = out.at[..., g * LANE:g * LANE + H].set(w[..., g * H:(g + 1) * H])
        return out

    slab = jnp.zeros((lay["rows"], G4), jnp.float32)

    # LSTM section (gate-major 128-lane padding).
    slab = slab.at[lay["off_wih"]:lay["off_wih"] + human_dim, :].set(
        pad_gate_cols(raw["w_ih"]))
    slab = slab.at[lay["off_whh"]:lay["off_whh"] + H, :].set(
        pad_gate_cols(raw["w_hh"]))
    slab = slab.at[lay["off_bl"]:lay["off_bl"] + 1, :].set(
        pad_gate_cols(raw["b_lstm"]))

    # MLP section: w1 (stacked over [h | self | action] rows), w2, fused wn.
    mlp_block = jnp.zeros((LANE, G4), jnp.float32)
    mlp_block = mlp_block.at[:in_dim, 0:hid].set(raw["w1"])
    mlp_block = mlp_block.at[:hid, LANE:LANE + hid].set(raw["w2"])
    mlp_block = mlp_block.at[:hid, 2 * LANE:2 * LANE + 1].set(raw["wn1"])
    mlp_block = mlp_block.at[:hid, 2 * LANE + 1:2 * LANE + 2].set(raw["wn2"])
    slab = slab.at[lay["off_mlp"]:lay["off_mlp"] + LANE, :].set(mlp_block)

    b_row = jnp.zeros((1, G4), jnp.float32)
    b_row = b_row.at[:, 0:hid].set(raw["b1"])
    b_row = b_row.at[:, LANE:LANE + hid].set(raw["b2"])
    b_row = b_row.at[0, 2 * LANE + 0].set(raw["bn1"][0, 0])
    b_row = b_row.at[0, 2 * LANE + 1].set(raw["bn2"][0, 0])
    slab = slab.at[lay["off_b"]:lay["off_b"] + 1, :].set(b_row)

    return slab


# ---------------------------------------------------------------------------
# Pure-JAX reference (matches the PyTorch forward) for correctness check.
# ---------------------------------------------------------------------------
def dqfunc_reference(raw, state, action, *, self_state_dim, action_dim):
    self_state = state[:, 0, :self_state_dim]
    human = state[:, :, self_state_dim:]
    B, T, _ = human.shape
    H = raw["w_hh"].shape[0]
    h = jnp.zeros((B, H), jnp.float32)
    c = jnp.zeros((B, H), jnp.float32)
    for t in range(T):
        g = human[:, t, :] @ raw["w_ih"] + h @ raw["w_hh"] + raw["b_lstm"]
        i_g = jax.nn.sigmoid(g[:, 0 * H:1 * H])
        f_g = jax.nn.sigmoid(g[:, 1 * H:2 * H])
        g_g = jnp.tanh(g[:, 2 * H:3 * H])
        o_g = jax.nn.sigmoid(g[:, 3 * H:4 * H])
        c = f_g * c + i_g * g_g
        h = o_g * jnp.tanh(c)
    x = jnp.concatenate([h, self_state, action.reshape(-1, action_dim)], axis=-1)
    x = jax.nn.relu(x @ raw["w1"] + raw["b1"])
    x = jax.nn.relu(x @ raw["w2"] + raw["b2"])
    return x @ raw["wn1"] + raw["bn1"], x @ raw["wn2"] + raw["bn2"]


if __name__ == "__main__":
    B = 2                # batch
    N_HUMANS = 5         # sequence length seen by the LSTM
    SELF_STATE_DIM = 6
    HUMAN_DIM = 7
    LSTM_HIDDEN = 32
    HIDDEN = 32
    ACTION_DIM = 2

    key = jax.random.PRNGKey(0)
    k_params, k_state, k_action = jax.random.split(key, 3)

    raw = init_raw_params(k_params, HUMAN_DIM, ACTION_DIM, HIDDEN,
                          LSTM_HIDDEN, SELF_STATE_DIM)
    slab = pack_params(raw, human_dim=HUMAN_DIM, hidden_size=HIDDEN,
                       lstm_hidden_dim=LSTM_HIDDEN,
                       self_state_dim=SELF_STATE_DIM, action_dim=ACTION_DIM)

    state = jax.random.normal(
        k_state, (B, N_HUMANS, SELF_STATE_DIM + HUMAN_DIM), jnp.float32)
    action = jax.random.normal(k_action, (B, ACTION_DIM), jnp.float32)

    q1, q2 = dqfunc_forward(slab, state, action,
                            self_state_dim=SELF_STATE_DIM,
                            action_dim=ACTION_DIM,
                            lstm_hidden_dim=LSTM_HIDDEN)
    jax.block_until_ready((q1, q2))

    r1, r2 = dqfunc_reference(raw, state, action,
                              self_state_dim=SELF_STATE_DIM,
                              action_dim=ACTION_DIM)

    assert q1.shape == (B, 1) and q2.shape == (B, 1)
    assert jnp.all(jnp.isfinite(q1)) and jnp.all(jnp.isfinite(q2))
    assert jnp.allclose(q1, r1, atol=1e-3, rtol=1e-3)
    assert jnp.allclose(q2, r2, atol=1e-3, rtol=1e-3)
    print("KERNEL_OK")
</pallas_src>

<mosaic_0001>
module attributes {stable_mosaic.version = 11 : i64} {
  func.func @dqfunc_fused_kernel(%arg0: i32, %arg1: memref<5x8x8xf32, #tpu.memory_space<vmem>>, %arg2: memref<8x128xf32, #tpu.memory_space<vmem>>, %arg3: memref<280x512xf32, #tpu.memory_space<vmem>>, %arg4: memref<8x128xf32, #tpu.memory_space<vmem>>) attributes {dimension_semantics = [#tpu.dimension_semantics<parallel>], iteration_bounds = array<i64: 1>, scalar_prefetch = 0 : i64, scratch_operands = 0 : i64, tpu.core_type = #tpu.core_type<tc>, window_params = [{transform_indices = @transform_0, window_bounds = array<i64: 5, 8, 8>}, {transform_indices = @transform_1, window_bounds = array<i64: 8, 128>}, {pipeline_mode = #tpu.pipeline_mode<synchronous>, transform_indices = @transform_2, window_bounds = array<i64: 280, 512>}, {transform_indices = @transform_3, window_bounds = array<i64: 8, 128>}]} {
    %c0 = arith.constant 0 : index
    %c0_0 = arith.constant 0 : index
    %0 = vector.load %arg3[%c0, %c0_0] : memref<280x512xf32, #tpu.memory_space<vmem>>, vector<8x512xf32>
    %c8 = arith.constant 8 : index
    %c0_1 = arith.constant 0 : index
    %1 = vector.load %arg3[%c8, %c0_1] : memref<280x512xf32, #tpu.memory_space<vmem>>, vector<128x512xf32>
    %c136 = arith.constant 136 : index
    %c0_2 = arith.constant 0 : index
    %2 = vector.load %arg3[%c136, %c0_2] : memref<280x512xf32, #tpu.memory_space<vmem>>, vector<1x512xf32>
    %c144 = arith.constant 144 : index
    %c0_3 = arith.constant 0 : index
    %3 = vector.load %arg3[%c144, %c0_3] : memref<280x512xf32, #tpu.memory_space<vmem>>, vector<128x128xf32>
    %c144_4 = arith.constant 144 : index
    %c128 = arith.constant 128 : index
    %4 = vector.load %arg3[%c144_4, %c128] : memref<280x512xf32, #tpu.memory_space<vmem>>, vector<128x128xf32>
    %c144_5 = arith.constant 144 : index
    %c256 = arith.constant 256 : index
    %5 = vector.load %arg3[%c144_5, %c256] : memref<280x512xf32, #tpu.memory_space<vmem>>, vector<128x128xf32>
    %c272 = arith.constant 272 : index
    %c0_6 = arith.constant 0 : index
    %6 = vector.load %arg3[%c272, %c0_6] : memref<280x512xf32, #tpu.memory_space<vmem>>, vector<1x128xf32>
    %c272_7 = arith.constant 272 : index
    %c128_8 = arith.constant 128 : index
    %7 = vector.load %arg3[%c272_7, %c128_8] : memref<280x512xf32, #tpu.memory_space<vmem>>, vector<1x128xf32>
    %c272_9 = arith.constant 272 : index
    %c256_10 = arith.constant 256 : index
    %8 = vector.load %arg3[%c272_9, %c256_10] : memref<280x512xf32, #tpu.memory_space<vmem>>, vector<1x128xf32>
    %c0_11 = arith.constant 0 : index
    %c0_12 = arith.constant 0 : index
    %c0_13 = arith.constant 0 : index
    %9 = vector.load %arg1[%c0_11, %c0_12, %c0_13] : memref<5x8x8xf32, #tpu.memory_space<vmem>>, vector<1x8x8xf32>
    %10 = vector.shape_cast %9 : vector<1x8x8xf32> to vector<8x8xf32>
    %cst = arith.constant dense<0.000000e+00> : vector<8x512xf32>
    %11 = tpu.matmul %10, %0, %cst {dimension_numbers = #tpu.dot_dimension_numbers<[1], [0], [0], [1], [0, 0, 1, 1], [], []>} : vector<8x8xf32>, vector<8x512xf32>, vector<8x512xf32> -> vector<8x512xf32>
    %12 = vector.broadcast %2 : vector<1x512xf32> to vector<8x512xf32>
    %13 = arith.addf %11, %12 : vector<8x512xf32>
    %c1 = arith.constant 1 : index
    %c0_14 = arith.constant 0 : index
    %c0_15 = arith.constant 0 : index
    %14 = vector.load %arg1[%c1, %c0_14, %c0_15] : memref<5x8x8xf32, #tpu.memory_space<vmem>>, vector<1x8x8xf32>
    %15 = vector.shape_cast %14 : vector<1x8x8xf32> to vector<8x8xf32>
    %cst_16 = arith.constant dense<0.000000e+00> : vector<8x512xf32>
    %16 = tpu.matmul %15, %0, %cst_16 {dimension_numbers = #tpu.dot_dimension_numbers<[1], [0], [0], [1], [0, 0, 1, 1], [], []>} : vector<8x8xf32>, vector<8x512xf32>, vector<8x512xf32> -> vector<8x512xf32>
    %17 = vector.broadcast %2 : vector<1x512xf32> to vector<8x512xf32>
    %18 = arith.addf %16, %17 : vector<8x512xf32>
    %c2 = arith.constant 2 : index
    %c0_17 = arith.constant 0 : index
    %c0_18 = arith.constant 0 : index
    %19 = vector.load %arg1[%c2, %c0_17, %c0_18] : memref<5x8x8xf32, #tpu.memory_space<vmem>>, vector<1x8x8xf32>
    %20 = vector.shape_cast %19 : vector<1x8x8xf32> to vector<8x8xf32>
    %cst_19 = arith.constant dense<0.000000e+00> : vector<8x512xf32>
    %21 = tpu.matmul %20, %0, %cst_19 {dimension_numbers = #tpu.dot_dimension_numbers<[1], [0], [0], [1], [0, 0, 1, 1], [], []>} : vector<8x8xf32>, vector<8x512xf32>, vector<8x512xf32> -> vector<8x512xf32>
    %22 = vector.broadcast %2 : vector<1x512xf32> to vector<8x512xf32>
    %23 = arith.addf %21, %22 : vector<8x512xf32>
    %c3 = arith.constant 3 : index
    %c0_20 = arith.constant 0 : index
    %c0_21 = arith.constant 0 : index
    %24 = vector.load %arg1[%c3, %c0_20, %c0_21] : memref<5x8x8xf32, #tpu.memory_space<vmem>>, vector<1x8x8xf32>
    %25 = vector.shape_cast %24 : vector<1x8x8xf32> to vector<8x8xf32>
    %cst_22 = arith.constant dense<0.000000e+00> : vector<8x512xf32>
    %26 = tpu.matmul %25, %0, %cst_22 {dimension_numbers = #tpu.dot_dimension_numbers<[1], [0], [0], [1], [0, 0, 1, 1], [], []>} : vector<8x8xf32>, vector<8x512xf32>, vector<8x512xf32> -> vector<8x512xf32>
    %27 = vector.broadcast %2 : vector<1x512xf32> to vector<8x512xf32>
    %28 = arith.addf %26, %27 : vector<8x512xf32>
    %c4 = arith.constant 4 : index
    %c0_23 = arith.constant 0 : index
    %c0_24 = arith.constant 0 : index
    %29 = vector.load %arg1[%c4, %c0_23, %c0_24] : memref<5x8x8xf32, #tpu.memory_space<vmem>>, vector<1x8x8xf32>
    %30 = vector.shape_cast %29 : vector<1x8x8xf32> to vector<8x8xf32>
    %cst_25 = arith.constant dense<0.000000e+00> : vector<8x512xf32>
    %31 = tpu.matmul %30, %0, %cst_25 {dimension_numbers = #tpu.dot_dimension_numbers<[1], [0], [0], [1], [0, 0, 1, 1], [], []>} : vector<8x8xf32>, vector<8x512xf32>, vector<8x512xf32> -> vector<8x512xf32>
    %32 = vector.broadcast %2 : vector<1x512xf32> to vector<8x512xf32>
    %33 = arith.addf %31, %32 : vector<8x512xf32>
    %cst_26 = arith.constant 0.000000e+00 : f32
    %34 = vector.broadcast %cst_26 : f32 to vector<8x128xf32>
    %cst_27 = arith.constant 0.000000e+00 : f32
    %35 = vector.broadcast %cst_27 : f32 to vector<8x128xf32>
    %cst_28 = arith.constant dense<0.000000e+00> : vector<8x512xf32>
    %36 = tpu.matmul %34, %1, %cst_28 {dimension_numbers = #tpu.dot_dimension_numbers<[1], [0], [0], [1], [0, 0, 1, 1], [], []>} : vector<8x128xf32>, vector<128x512xf32>, vector<8x512xf32> -> vector<8x512xf32>
    %37 = arith.addf %13, %36 : vector<8x512xf32>
    %38 = vector.extract_strided_slice %37 {offsets = [0, 0], sizes = [8, 128], strides = [1, 1]} : vector<8x512xf32> to vector<8x128xf32>
    %39 = arith.negf %38 : vector<8x128xf32>
    %40 = math.exp %39 : vector<8x128xf32>
    %cst_29 = arith.constant 1.000000e+00 : f32
    %41 = vector.broadcast %cst_29 : f32 to vector<8x128xf32>
    %42 = arith.addf %41, %40 : vector<8x128xf32>
    %43 = arith.divf %41, %42 : vector<8x128xf32>
    %44 = vector.extract_strided_slice %37 {offsets = [0, 128], sizes = [8, 128], strides = [1, 1]} : vector<8x512xf32> to vector<8x128xf32>
    %45 = arith.negf %44 : vector<8x128xf32>
    %46 = math.exp %45 : vector<8x128xf32>
    %cst_30 = arith.constant 1.000000e+00 : f32
    %47 = vector.broadcast %cst_30 : f32 to vector<8x128xf32>
    %48 = arith.addf %47, %46 : vector<8x128xf32>
    %49 = arith.divf %47, %48 : vector<8x128xf32>
    %50 = vector.extract_strided_slice %37 {offsets = [0, 256], sizes = [8, 128], strides = [1, 1]} : vector<8x512xf32> to vector<8x128xf32>
    %51 = math.tanh %50 : vector<8x128xf32>
    %52 = vector.extract_strided_slice %37 {offsets = [0, 384], sizes = [8, 128], strides = [1, 1]} : vector<8x512xf32> to vector<8x128xf32>
    %53 = arith.negf %52 : vector<8x128xf32>
    %54 = math.exp %53 : vector<8x128xf32>
    %cst_31 = arith.constant 1.000000e+00 : f32
    %55 = vector.broadcast %cst_31 : f32 to vector<8x128xf32>
    %56 = arith.addf %55, %54 : vector<8x128xf32>
    %57 = arith.divf %55, %56 : vector<8x128xf32>
    %58 = arith.mulf %49, %35 : vector<8x128xf32>
    %59 = arith.mulf %43, %51 : vector<8x128xf32>
    %60 = arith.addf %58, %59 : vector<8x128xf32>
    %61 = math.tanh %60 : vector<8x128xf32>
    %62 = arith.mulf %57, %61 : vector<8x128xf32>
    %cst_32 = arith.constant dense<0.000000e+00> : vector<8x512xf32>
    %63 = tpu.matmul %62, %1, %cst_32 {dimension_numbers = #tpu.dot_dimension_numbers<[1], [0], [0], [1], [0, 0, 1, 1], [], []>} : vector<8x128xf32>, vector<128x512xf32>, vector<8x512xf32> -> vector<8x512xf32>
    %64 = arith.addf %18, %63 : vector<8x512xf32>
    %65 = vector.extract_strided_slice %64 {offsets = [0, 0], sizes = [8, 128], strides = [1, 1]} : vector<8x512xf32> to vector<8x128xf32>
    %66 = arith.negf %65 : vector<8x128xf32>
    %67 = math.exp %66 : vector<8x128xf32>
    %cst_33 = arith.constant 1.000000e+00 : f32
    %68 = vector.broadcast %cst_33 : f32 to vector<8x128xf32>
    %69 = arith.addf %68, %67 : vector<8x128xf32>
    %70 = arith.divf %68, %69 : vector<8x128xf32>
    %71 = vector.extract_strided_slice %64 {offsets = [0, 128], sizes = [8, 128], strides = [1, 1]} : vector<8x512xf32> to vector<8x128xf32>
    %72 = arith.negf %71 : vector<8x128xf32>
    %73 = math.exp %72 : vector<8x128xf32>
    %cst_34 = arith.constant 1.000000e+00 : f32
    %74 = vector.broadcast %cst_34 : f32 to vector<8x128xf32>
    %75 = arith.addf %74, %73 : vector<8x128xf32>
    %76 = arith.divf %74, %75 : vector<8x128xf32>
    %77 = vector.extract_strided_slice %64 {offsets = [0, 256], sizes = [8, 128], strides = [1, 1]} : vector<8x512xf32> to vector<8x128xf32>
    %78 = math.tanh %77 : vector<8x128xf32>
    %79 = vector.extract_strided_slice %64 {offsets = [0, 384], sizes = [8, 128], strides = [1, 1]} : vector<8x512xf32> to vector<8x128xf32>
    %80 = arith.negf %79 : vector<8x128xf32>
    %81 = math.exp %80 : vector<8x128xf32>
    %cst_35 = arith.constant 1.000000e+00 : f32
    %82 = vector.broadcast %cst_35 : f32 to vector<8x128xf32>
    %83 = arith.addf %82, %81 : vector<8x128xf32>
    %84 = arith.divf %82, %83 : vector<8x128xf32>
    %85 = arith.mulf %76, %60 : vector<8x128xf32>
    %86 = arith.mulf %70, %78 : vector<8x128xf32>
    %87 = arith.addf %85, %86 : vector<8x128xf32>
    %88 = math.tanh %87 : vector<8x128xf32>
    %89 = arith.mulf %84, %88 : vector<8x128xf32>
    %cst_36 = arith.constant dense<0.000000e+00> : vector<8x512xf32>
    %90 = tpu.matmul %89, %1, %cst_36 {dimension_numbers = #tpu.dot_dimension_numbers<[1], [0], [0], [1], [0, 0, 1, 1], [], []>} : vector<8x128xf32>, vector<128x512xf32>, vector<8x512xf32> -> vector<8x512xf32>
    %91 = arith.addf %23, %90 : vector<8x512xf32>
    %92 = vector.extract_strided_slice %91 {offsets = [0, 0], sizes = [8, 128], strides = [1, 1]} : vector<8x512xf32> to vector<8x128xf32>
    %93 = arith.negf %92 : vector<8x128xf32>
    %94 = math.exp %93 : vector<8x128xf32>
    %cst_37 = arith.constant 1.000000e+00 : f32
    %95 = vector.broadcast %cst_37 : f32 to vector<8x128xf32>
    %96 = arith.addf %95, %94 : vector<8x128xf32>
    %97 = arith.divf %95, %96 : vector<8x128xf32>
    %98 = vector.extract_strided_slice %91 {offsets = [0, 128], sizes = [8, 128], strides = [1, 1]} : vector<8x512xf32> to vector<8x128xf32>
    %99 = arith.negf %98 : vector<8x128xf32>
    %100 = math.exp %99 : vector<8x128xf32>
    %cst_38 = arith.constant 1.000000e+00 : f32
    %101 = vector.broadcast %cst_38 : f32 to vector<8x128xf32>
    %102 = arith.addf %101, %100 : vector<8x128xf32>
    %103 = arith.divf %101, %102 : vector<8x128xf32>
    %104 = vector.extract_strided_slice %91 {offsets = [0, 256], sizes = [8, 128], strides = [1, 1]} : vector<8x512xf32> to vector<8x128xf32>
    %105 = math.tanh %104 : vector<8x128xf32>
    %106 = vector.extract_strided_slice %91 {offsets = [0, 384], sizes = [8, 128], strides = [1, 1]} : vector<8x512xf32> to vector<8x128xf32>
    %107 = arith.negf %106 : vector<8x128xf32>
    %108 = math.exp %107 : vector<8x128xf32>
    %cst_39 = arith.constant 1.000000e+00 : f32
    %109 = vector.broadcast %cst_39 : f32 to vector<8x128xf32>
    %110 = arith.addf %109, %108 : vector<8x128xf32>
    %111 = arith.divf %109, %110 : vector<8x128xf32>
    %112 = arith.mulf %103, %87 : vector<8x128xf32>
    %113 = arith.mulf %97, %105 : vector<8x128xf32>
    %114 = arith.addf %112, %113 : vector<8x128xf32>
    %115 = math.tanh %114 : vector<8x128xf32>
    %116 = arith.mulf %111, %115 : vector<8x128xf32>
    %cst_40 = arith.constant dense<0.000000e+00> : vector<8x512xf32>
    %117 = tpu.matmul %116, %1, %cst_40 {dimension_numbers = #tpu.dot_dimension_numbers<[1], [0], [0], [1], [0, 0, 1, 1], [], []>} : vector<8x128xf32>, vector<128x512xf32>, vector<8x512xf32> -> vector<8x512xf32>
    %118 = arith.addf %28, %117 : vector<8x512xf32>
    %119 = vector.extract_strided_slice %118 {offsets = [0, 0], sizes = [8, 128], strides = [1, 1]} : vector<8x512xf32> to vector<8x128xf32>
    %120 = arith.negf %119 : vector<8x128xf32>
    %121 = math.exp %120 : vector<8x128xf32>
    %cst_41 = arith.constant 1.000000e+00 : f32
    %122 = vector.broadcast %cst_41 : f32 to vector<8x128xf32>
    %123 = arith.addf %122, %121 : vector<8x128xf32>
    %124 = arith.divf %122, %123 : vector<8x128xf32>
    %125 = vector.extract_strided_slice %118 {offsets = [0, 128], sizes = [8, 128], strides = [1, 1]} : vector<8x512xf32> to vector<8x128xf32>
    %126 = arith.negf %125 : vector<8x128xf32>
    %127 = math.exp %126 : vector<8x128xf32>
    %cst_42 = arith.constant 1.000000e+00 : f32
    %128 = vector.broadcast %cst_42 : f32 to vector<8x128xf32>
    %129 = arith.addf %128, %127 : vector<8x128xf32>
    %130 = arith.divf %128, %129 : vector<8x128xf32>
    %131 = vector.extract_strided_slice %118 {offsets = [0, 256], sizes = [8, 128], strides = [1, 1]} : vector<8x512xf32> to vector<8x128xf32>
    %132 = math.tanh %131 : vector<8x128xf32>
    %133 = vector.extract_strided_slice %118 {offsets = [0, 384], sizes = [8, 128], strides = [1, 1]} : vector<8x512xf32> to vector<8x128xf32>
    %134 = arith.negf %133 : vector<8x128xf32>
    %135 = math.exp %134 : vector<8x128xf32>
    %cst_43 = arith.constant 1.000000e+00 : f32
    %136 = vector.broadcast %cst_43 : f32 to vector<8x128xf32>
    %137 = arith.addf %136, %135 : vector<8x128xf32>
    %138 = arith.divf %136, %137 : vector<8x128xf32>
    %139 = arith.mulf %130, %114 : vector<8x128xf32>
    %140 = arith.mulf %124, %132 : vector<8x128xf32>
    %141 = arith.addf %139, %140 : vector<8x128xf32>
    %142 = math.tanh %141 : vector<8x128xf32>
    %143 = arith.mulf %138, %142 : vector<8x128xf32>
    %cst_44 = arith.constant dense<0.000000e+00> : vector<8x512xf32>
    %144 = tpu.matmul %143, %1, %cst_44 {dimension_numbers = #tpu.dot_dimension_numbers<[1], [0], [0], [1], [0, 0, 1, 1], [], []>} : vector<8x128xf32>, vector<128x512xf32>, vector<8x512xf32> -> vector<8x512xf32>
    %145 = arith.addf %33, %144 : vector<8x512xf32>
    %146 = vector.extract_strided_slice %145 {offsets = [0, 0], sizes = [8, 128], strides = [1, 1]} : vector<8x512xf32> to vector<8x128xf32>
    %147 = arith.negf %146 : vector<8x128xf32>
    %148 = math.exp %147 : vector<8x128xf32>
    %cst_45 = arith.constant 1.000000e+00 : f32
    %149 = vector.broadcast %cst_45 : f32 to vector<8x128xf32>
    %150 = arith.addf %149, %148 : vector<8x128xf32>
    %151 = arith.divf %149, %150 : vector<8x128xf32>
    %152 = vector.extract_strided_slice %145 {offsets = [0, 128], sizes = [8, 128], strides = [1, 1]} : vector<8x512xf32> to vector<8x128xf32>
    %153 = arith.negf %152 : vector<8x128xf32>
    %154 = math.exp %153 : vector<8x128xf32>
    %cst_46 = arith.constant 1.000000e+00 : f32
    %155 = vector.broadcast %cst_46 : f32 to vector<8x128xf32>
    %156 = arith.addf %155, %154 : vector<8x128xf32>
    %157 = arith.divf %155, %156 : vector<8x128xf32>
    %158 = vector.extract_strided_slice %145 {offsets = [0, 256], sizes = [8, 128], strides = [1, 1]} : vector<8x512xf32> to vector<8x128xf32>
    %159 = math.tanh %158 : vector<8x128xf32>
    %160 = vector.extract_strided_slice %145 {offsets = [0, 384], sizes = [8, 128], strides = [1, 1]} : vector<8x512xf32> to vector<8x128xf32>
    %161 = arith.negf %160 : vector<8x128xf32>
    %162 = math.exp %161 : vector<8x128xf32>
    %cst_47 = arith.constant 1.000000e+00 : f32
    %163 = vector.broadcast %cst_47 : f32 to vector<8x128xf32>
    %164 = arith.addf %163, %162 : vector<8x128xf32>
    %165 = arith.divf %163, %164 : vector<8x128xf32>
    %166 = arith.mulf %157, %141 : vector<8x128xf32>
    %167 = arith.mulf %151, %159 : vector<8x128xf32>
    %168 = arith.addf %166, %167 : vector<8x128xf32>
    %169 = math.tanh %168 : vector<8x128xf32>
    %170 = arith.mulf %165, %169 : vector<8x128xf32>
    %c0_48 = arith.constant 0 : index
    %c0_49 = arith.constant 0 : index
    %171 = vector.load %arg2[%c0_48, %c0_49] : memref<8x128xf32, #tpu.memory_space<vmem>>, vector<8x128xf32>
    %172 = arith.addf %170, %171 : vector<8x128xf32>
    %cst_50 = arith.constant dense<0.000000e+00> : vector<8x128xf32>
    %173 = tpu.matmul %172, %3, %cst_50 {dimension_numbers = #tpu.dot_dimension_numbers<[1], [0], [0], [1], [0, 0, 1, 1], [], []>} : vector<8x128xf32>, vector<128x128xf32>, vector<8x128xf32> -> vector<8x128xf32>
    %174 = vector.broadcast %6 : vector<1x128xf32> to vector<8x128xf32>
    %175 = arith.addf %173, %174 : vector<8x128xf32>
    %cst_51 = arith.constant 0.000000e+00 : f32
    %176 = vector.broadcast %cst_51 : f32 to vector<8x128xf32>
    %177 = arith.maximumf %175, %176 : vector<8x128xf32>
    %cst_52 = arith.constant dense<0.000000e+00> : vector<8x128xf32>
    %178 = tpu.matmul %177, %4, %cst_52 {dimension_numbers = #tpu.dot_dimension_numbers<[1], [0], [0], [1], [0, 0, 1, 1], [], []>} : vector<8x128xf32>, vector<128x128xf32>, vector<8x128xf32> -> vector<8x128xf32>
    %179 = vector.broadcast %7 : vector<1x128xf32> to vector<8x128xf32>
    %180 = arith.addf %178, %179 : vector<8x128xf32>
    %cst_53 = arith.constant 0.000000e+00 : f32
    %181 = vector.broadcast %cst_53 : f32 to vector<8x128xf32>
    %182 = arith.maximumf %180, %181 : vector<8x128xf32>
    %cst_54 = arith.constant dense<0.000000e+00> : vector<8x128xf32>
    %183 = tpu.matmul %182, %5, %cst_54 {dimension_numbers = #tpu.dot_dimension_numbers<[1], [0], [0], [1], [0, 0, 1, 1], [], []>} : vector<8x128xf32>, vector<128x128xf32>, vector<8x128xf32> -> vector<8x128xf32>
    %184 = vector.broadcast %8 : vector<1x128xf32> to vector<8x128xf32>
    %185 = arith.addf %183, %184 : vector<8x128xf32>
    %c0_55 = arith.constant 0 : index
    %c0_56 = arith.constant 0 : index
    %186 = vector.load %arg4[%c0_55, %c0_56] : memref<8x128xf32, #tpu.memory_space<vmem>>, vector<8x128xf32>
    tpu.vector_store %arg4[%c0_55, %c0_56], %185 {strides = array<i32>} : memref<8x128xf32, #tpu.memory_space<vmem>>, vector<8x128xf32>,
    return
  }
  func.func @transform_0(%arg0: i32) -> (i32, i32, i32) {
    %c0_i32 = arith.constant 0 : i32
    %c0_i32_0 = arith.constant 0 : i32
    %c0_i32_1 = arith.constant 0 : i32
    return %c0_i32, %arg0, %c0_i32_0 : i32, i32, i32
  }
  func.func @transform_1(%arg0: i32) -> (i32, i32) {
    %c0_i32 = arith.constant 0 : i32
    %c0_i32_0 = arith.constant 0 : i32
    return %arg0, %c0_i32 : i32, i32
  }
  func.func @transform_2(%arg0: i32) -> (i32, i32) {
    %c0_i32 = arith.constant 0 : i32
    %c0_i32_0 = arith.constant 0 : i32
    %c0_i32_1 = arith.constant 0 : i32
    return %c0_i32, %c0_i32_0 : i32, i32
  }
  func.func @transform_3(%arg0: i32) -> (i32, i32) {
    %c0_i32 = arith.constant 0 : i32
    %c0_i32_0 = arith.constant 0 : i32
    return %arg0, %c0_i32 : i32, i32
  }
}

</mosaic_0001>

<bundles_post_ra>
// kernel: dqfunc_forward.1
= control target key start
LH: loop header
LB: loop body
LE: loop exit
PB: predicated region body
PF: predicated region fallthrough
CT: control target
= control target key end

     0   :  { %8 = vsyncpa [#allocation3], 0  ;;  %s2702_s12 = smov [#allocation2]   ;;  %s3141_s0 = inlined_call_operand.vmem [shape: f32[5,8,8], index: 0, kind: input, shape index: {}]   ;;  %s3142_s1 = inlined_call_operand.vmem [shape: f32[8,128], index: 1, kind: input, shape index: {}]   ;;  %s3143_s2 = inlined_call_operand.hbm [shape: f32[280,512], index: 2, kind: input, shape index: {}]   ;;  %s3144_s3 = inlined_call_operand.vmem [shape: f32[8,128], index: 3, kind: output, shape index: {}]  }
   0x1   :  { %s18_s13 = sshll.u32 %s2702_s12, 4  ;;  %s2678_s16 = scalar_lea.hbm %s3143_s2, 17920  ;;  %s19_s13 = int_to_ptr.vmem [resolvable:$true] %s18_s13 }
   0x2   :  { %p2679_p0 = scmp.ne.s32.totalorder %s3143_s2, %s2678_s16  ;;  %p2682_p1 = scmp.lt.u32.totalorder %s2678_s16, %s3143_s2 }
   0x4   :  { %p2684_p2 = pnand %p2682_p1, %p2679_p0 }
   0x6   :  { %2687 = shalt.err (!%p2684_p2)
}
   0x7   :  { %s2688_s21 = scalar_lea.vmem %s19_s13, 17920  ;;  %p2693_p4 = scmp.lt.s32.totalorder %s19_s13, %s19_s13 }
   0x8   :  { %p2689_p3 = scmp.ne.s32.totalorder %s19_s13, %s2688_s21  ;;  %p2694_p5 = scmp.lt.s32.totalorder %s2688_s21, %s2688_s21 }
   0xa   :  { %p2695_p6 = por %p2694_p5, %p2693_p4 }
   0xc   :  { %p2696_p7 = pnand %p2695_p6, %p2689_p3 }
   0xe   :  { %2699 = shalt.err (!%p2696_p7)
}
   0xf   :  { %s2703_s22 = smov 512   ;;  %s2704_s23 = smov 32  }
  0x10   :  { %24 = dma.hbm_to_vmem [thread:$0]  %s3143_s2, 17920, %s19_s13, [#allocation3], %s2703_s22, %s2703_s22, %s2704_s23  }
  0x11   :  { %2700 = dma.done.wait [#allocation3], 17920  }
  0x12   :  { %2701 = vsyncadd [#allocation3], 4294949376  ;;  %v2705_v0 = vmov 0.0   ;;  %v2742_v1 = vld [vmem:[#allocation2 + $0x8] sm:$0xff]  ;;  %v2744_v2 = vld [vmem:[#allocation2] sm:$0xff]  ;;  %vm171_vm0 = vcmask 64512  }
  0x13   :  { %239 = vmatprep.mubr.f32.mxu1 %v2705_v0  ;;  %827 = vmatprep.mubr.f32.mxu0 %v2705_v0  ;;  %v149_v3 = vld [vmem:[%s3141_s0] sm:$0xff]  ;;  %v2751_v4 = vld [vmem:[#allocation2 + $0x18] sm:$0xff]  ;;  %v33_v5 = vld [vmem:[#allocation2 + $0x28] sm:$0xff]  ;;  %vm2707_vm1 = vmmov 0  }
  0x14   :  { %175 = vmatprep.subr.mxu1 %v2742_v1  ;;  %763 = vmatprep.subr.mxu0 %v2742_v1  ;;  %v37_v6 = vld [vmem:[#allocation2 + $0x48] sm:$0xff]  ;;  %v2757_v8 = vld [vmem:[#allocation2 + $0x10] sm:$0xff]  ;;  %v2762_v9 = vld [vmem:[%s3141_s0 + $0x20] sm:$0xff] }
  0x15   :  { %176 = vmatpush1.msra.mxu1 %v2744_v2  ;;  %764 = vmatpush1.msra.mxu0 %v2744_v2  ;;  %v2755_v7 = vpack.c.bf16 %v37_v6, %v33_v5  ;;  %v32_v10 = vld [vmem:[#allocation2 + $0x20] sm:$0xff]  ;;  %v41_v12 = vld [vmem:[#allocation2 + $0x68] sm:$0xff]  ;;  %v1980_v37 = vld [vmem:[%s3141_s0 + $0x10] sm:$0xff] }
  0x16   :  { %1975 = vmatmul.mubr.msk.f32.vlgmr.msra.gmra.mrb[0].mxu1 %vm171_vm0, %v149_v3  ;;  %246 = vmatprep.subr.mxu1 %v2751_v4  ;;  %v36_v11 = vld [vmem:[#allocation2 + $0x40] sm:$0xff]  ;;  %v45_v13 = vld [vmem:[#allocation2 + $0x88] sm:$0xff]  ;;  %v1983_v50 = vld [vmem:[%s3141_s0 + $0x18] sm:$0xff] }
  0x17   :  { %2161 = vmatprep.subr.bf16.mxu0 %v2755_v7  ;;  %247 = vmatpush1.msra.mxu1 %v2757_v8  ;;  %v2768_v14 = vpack.c.bf16 %v36_v11, %v32_v10  ;;  %v2770_v15 = vpack.c.bf16 %v45_v13, %v41_v12  ;;  %v40_v16 = vld [vmem:[#allocation2 + $0x60] sm:$0xff]  ;;  %v49_v18 = vld [vmem:[#allocation2 + $0xa8] sm:$0xff]  ;;  %v35_v54 = vld [vmem:[#allocation2 + $0x38] sm:$0xff] }
  0x18   :  { %v44_v17 = vld [vmem:[#allocation2 + $0x80] sm:$0xff]  ;;  %1987 = vmatmul.mubr.msk.f32.vlgmr.msra.gmra.mrb[0].mxu0 %vm171_vm0, %v2762_v9  ;;  %310 = vmatprep.mubr.f32.mxu1 %v2705_v0  ;;  %v53_v19 = vld [vmem:[#allocation2 + $0xc8] sm:$0xff]  ;;  %v39_v55 = vld [vmem:[#allocation2 + $0x58] sm:$0xff] }
  0x19   :  { %2163 = vmatpush1.bf16.msra.mxu0 %v2768_v14  ;;  %322 = vmatprep.subr.mxu1 %v2742_v1  ;;  %v2777_v20 = vpack.c.bf16 %v44_v17, %v40_v16  ;;  %v2781_v21 = vpack.c.bf16 %v53_v19, %v49_v18  ;;  %v48_v22 = vld [vmem:[#allocation2 + $0xa0] sm:$0xff]  ;;  %v1977_v24 = vld [vmem:[%s3141_s0 + $0x8] sm:$0xff]  ;;  %v2846_v59 = vpack.c.bf16 %v39_v55, %v35_v54  ;;  %v34_v60 = vld [vmem:[#allocation2 + $0x30] sm:$0xff] }
  0x1a   :  { %1976 = vmatmul.mubr.msk.f32.vlgmr.msra.gmra.mrb[2].mxu1 %vm171_vm0, %v149_v3  ;;  %2165 = vmatprep.subr.bf16.mxu0 %v2770_v15  ;;  %v52_v23 = vld [vmem:[#allocation2 + $0xc0] sm:$0xff]  ;;  %v57_v25 = vld [vmem:[#allocation2 + $0xe8] sm:$0xff]  ;;  %v38_v61 = vld [vmem:[#allocation2 + $0x50] sm:$0xff] }
  0x1b   :  { %323 = vmatpush1.msra.mxu1 %v2744_v2  ;;  %386 = vmatprep.mubr.f32.mxu1 %v2705_v0  ;;  %v61_v26 = vld [vmem:[#allocation2 + $0x108] sm:$0xff]  ;;  %v2791_v27 = vpack.c.bf16 %v52_v23, %v48_v22  ;;  %v56_v29 = vld [vmem:[#allocation2 + $0xe0] sm:$0xff]  ;;  %v43_v63 = vld [vmem:[#allocation2 + $0x78] sm:$0xff] }
  0x1c   :  { %393 = vmatprep.subr.mxu1 %v2751_v4  ;;  %969 = vmatprep.mubr.f32.mxu0 %v2705_v0  ;;  %v2795_v28 = vpack.c.bf16 %v61_v26, %v57_v25  ;;  %v60_v30 = vld [vmem:[#allocation2 + $0x100] sm:$0xff]  ;;  %v65_v31 = vld [vmem:[#allocation2 + $0x128] sm:$0xff]  ;;  %v46_v5 = vld [vmem:[#allocation2 + $0x90] sm:$0xff] }
  0x1d   :  { %2167 = vmatpush1.bf16.msra.mxu0 %v2777_v20  ;;  %v69_v32 = vld [vmem:[#allocation2 + $0x148] sm:$0xff]  ;;  %v2801_v33 = vpack.c.bf16 %v60_v30, %v56_v29  ;;  %v64_v35 = vld [vmem:[#allocation2 + $0x120] sm:$0xff]  ;;  %v51_v6 = vld [vmem:[#allocation2 + $0xb8] sm:$0xff] }
  0x1e   :  { %1978 = vmatmul.mubr.msk.f32.vlgmr.msra.gmra.mrb[4].mxu1 %vm171_vm0, %v1977_v24  ;;  %2169 = vmatprep.subr.bf16.mxu0 %v2781_v21  ;;  %v2805_v34 = vpack.c.bf16 %v69_v32, %v65_v31  ;;  %v68_v36 = vld [vmem:[#allocation2 + $0x140] sm:$0xff]  ;;  %v73_v38 = vld [vmem:[#allocation2 + $0x168] sm:$0xff]  ;;  %v55_v10 = vld [vmem:[#allocation2 + $0xd8] sm:$0xff] }
  0x1f   :  { %394 = vmatpush1.msra.mxu1 %v2757_v8  ;;  %457 = vmatprep.mubr.f32.mxu1 %v2705_v0  ;;  %v77_v39 = vld [vmem:[#allocation2 + $0x188] sm:$0xff]  ;;  %v2814_v40 = vpack.c.bf16 %v68_v36, %v64_v35  ;;  %v72_v42 = vld [vmem:[#allocation2 + $0x160] sm:$0xff]  ;;  %v2870_v11 = vpack.c.bf16 %v55_v10, %v51_v6  ;;  %v50_v12 = vld [vmem:[#allocation2 + $0xb0] sm:$0xff] }
  0x20   :  { %469 = vmatprep.subr.mxu1 %v2742_v1  ;;  %v2818_v41 = vpack.c.bf16 %v77_v39, %v73_v38  ;;  %v76_v43 = vld [vmem:[#allocation2 + $0x180] sm:$0xff]  ;;  %v81_v44 = vld [vmem:[#allocation2 + $0x1a8] sm:$0xff]  ;;  %v54_v13 = vld [vmem:[#allocation2 + $0xd0] sm:$0xff] }
  0x21   :  { %2171 = vmatpush1.bf16.msra.mxu0 %v2791_v27  ;;  %v85_v45 = vld [vmem:[#allocation2 + $0x1c8] sm:$0xff]  ;;  %v2824_v46 = vpack.c.bf16 %v76_v43, %v72_v42  ;;  %v80_v48 = vld [vmem:[#allocation2 + $0x1a0] sm:$0xff]  ;;  %v59_v16 = vld [vmem:[#allocation2 + $0xf8] sm:$0xff] }
  0x22   :  { %1979 = vmatmul.mubr.msk.f32.vlgmr.msra.gmra.mrb[6].mxu1 %vm171_vm0, %v1977_v24  ;;  %2173 = vmatprep.subr.bf16.mxu0 %v2795_v28  ;;  %v2828_v47 = vpack.c.bf16 %v85_v45, %v81_v44  ;;  %v84_v49 = vld [vmem:[#allocation2 + $0x1c0] sm:$0xff]  ;;  %v89_v51 = vld [vmem:[#allocation2 + $0x1e8] sm:$0xff]  ;;  %v63_v17 = vld [vmem:[#allocation2 + $0x118] sm:$0xff] }
  0x23   :  { %470 = vmatpush1.msra.mxu1 %v2744_v2  ;;  %533 = vmatprep.mubr.f32.mxu1 %v2705_v0  ;;  %v93_v52 = vld [vmem:[#allocation2 + $0x208] sm:$0xff]  ;;  %v2837_v53 = vpack.c.bf16 %v84_v49, %v80_v48  ;;  %v88_v57 = vld [vmem:[#allocation2 + $0x1e0] sm:$0xff]  ;;  %v2879_v18 = vpack.c.bf16 %v63_v17, %v59_v16  ;;  %v58_v19 = vld [vmem:[#allocation2 + $0xf0] sm:$0xff] }
  0x24   :  { %540 = vmatprep.subr.mxu1 %v2751_v4  ;;  %v2841_v56 = vpack.c.bf16 %v93_v52, %v89_v51  ;;  %v92_v58 = vld [vmem:[#allocation2 + $0x200] sm:$0xff]  ;;  %v62_v22 = vld [vmem:[#allocation2 + $0x110] sm:$0xff]  ;;  %v67_v23 = vld [vmem:[#allocation2 + $0x138] sm:$0xff] }
  0x25   :  { %2175 = vmatpush1.bf16.msra.mxu0 %v2801_v33  ;;  %v2849_v62 = vpack.c.bf16 %v92_v58, %v88_v57  ;;  %v71_v24 = vld [vmem:[#allocation2 + $0x158] sm:$0xff]  ;;  %v2884_v25 = vpack.c.bf16 %v62_v22, %v58_v19  ;;  %v66_v29 = vld [vmem:[#allocation2 + $0x130] sm:$0xff] }
  0x26   :  { %1981 = vmatmul.mubr.msk.f32.vlgmr.msra.gmra.mrb[8].mxu1 %vm171_vm0, %v1980_v37  ;;  %2177 = vmatprep.subr.bf16.mxu0 %v2805_v34  ;;  %v2887_v26 = vpack.c.bf16 %v71_v24, %v67_v23  ;;  %v70_v30 = vld [vmem:[#allocation2 + $0x150] sm:$0xff]  ;;  %v75_v31 = vld [vmem:[#allocation2 + $0x178] sm:$0xff] }
  0x27   :  { %541 = vmatpush1.msra.mxu1 %v2757_v8  ;;  %604 = vmatprep.mubr.f32.mxu1 %v2705_v0  ;;  %v79_v32 = vld [vmem:[#allocation2 + $0x198] sm:$0xff]  ;;  %v2892_v35 = vpack.c.bf16 %v70_v30, %v66_v29  ;;  %v78_v38 = vld [vmem:[#allocation2 + $0x190] sm:$0xff] }
  0x28   :  { %616 = vmatprep.subr.mxu1 %v2742_v1  ;;  %v47_v1 = vld [vmem:[#allocation2 + $0x98] sm:$0xff]  ;;  %v2895_v36 = vpack.c.bf16 %v79_v32, %v75_v31  ;;  %v82_v45 = vld [vmem:[#allocation2 + $0x1b0] sm:$0xff] }
  0x29   :  { %2179 = vmatpush1.bf16.msra.mxu0 %v2814_v40  ;;  %v2858_v3 = vpack.c.bf16 %v47_v1, %v43_v63  ;;  %v83_v39 = vld [vmem:[#allocation2 + $0x1b8] sm:$0xff]  ;;  %v86_v48 = vld [vmem:[#allocation2 + $0x1d0] sm:$0xff] }
  0x2a   :  { %1982 = vmatmul.mubr.msk.f32.vlgmr.msra.gmra.mrb[10].mxu1 %vm171_vm0, %v1980_v37  ;;  %2181 = vmatprep.subr.bf16.mxu0 %v2818_v41  ;;  %v74_v37 = vld [vmem:[#allocation2 + $0x170] sm:$0xff]  ;;  %v87_v42 = vld [vmem:[#allocation2 + $0x1d8] sm:$0xff]  ;;  %v2908_v51 = vpack.c.bf16 %v86_v48, %v82_v45 }
  0x2b   :  { %617 = vmatpush1.msra.mxu1 %v2744_v2  ;;  %680 = vmatprep.mubr.f32.mxu1 %v2705_v0  ;;  %v2855_v2 = vpack.c.bf16 %v38_v61, %v34_v60  ;;  %v2900_v43 = vpack.c.bf16 %v78_v38, %v74_v37  ;;  %v2903_v44 = vpack.c.bf16 %v87_v42, %v83_v39  ;;  %v91_v49 = vld [vmem:[#allocation2 + $0x1f8] sm:$0xff]  ;;  %v90_v54 = vld [vmem:[#allocation2 + $0x1f0] sm:$0xff] }
  0x2c   :  { %687 = vmatprep.subr.mxu1 %v2751_v4  ;;  %v94_v55 = vld [vmem:[#allocation2 + $0x210] sm:$0xff] }
  0x2d   :  { %2183 = vmatpush1.bf16.msra.mxu0 %v2824_v46  ;;  %v2916_v57 = vpack.c.bf16 %v94_v55, %v90_v54  ;;  %v97_v16 = vld [vmem:[#allocation2 + $0x220] ss:$8 sm:$0xf] }
  0x2e   :  { %1984 = vmatmul.mubr.msk.f32.vlgmr.msra.gmra.mrb[12].mxu1 %vm171_vm0, %v1983_v50  ;;  %2185 = vmatprep.subr.bf16.mxu0 %v2828_v47 }
  0x2f   :  { %688 = vmatpush1.msra.mxu1 %v2757_v8  ;;  %751 = vmatprep.mubr.f32.mxu1 %v2705_v0 }
  0x30   :  { %834 = vmatprep.subr.mxu1 %v2751_v4  ;;  %v42_v4 = vld [vmem:[#allocation2 + $0x70] sm:$0xff] }
  0x31   :  { %2187 = vmatpush1.bf16.msra.mxu0 %v2837_v53 }
  0x32   :  { %1985 = vmatmul.mubr.msk.f32.vlgmr.msra.gmra.mrb[14].mxu1 %vm171_vm0, %v1983_v50  ;;  %2189 = vmatprep.subr.bf16.mxu0 %v2841_v56  ;;  %v95_v50 = vld [vmem:[#allocation2 + $0x218] sm:$0xff] }
  0x33   :  { %835 = vmatpush1.msra.mxu1 %v2757_v8  ;;  %898 = vmatprep.mubr.f32.mxu1 %v2705_v0  ;;  %v2865_v8 = vpack.c.bf16 %v46_v5, %v42_v4  ;;  %v2911_v52 = vpack.c.bf16 %v95_v50, %v91_v49  ;;  %v151_v4 = vlaneseq }
  0x34   :  { %2193 = vmatprep.subr.bf16.mxu1 %v2846_v59 }
  0x35   :  { %2191 = vmatpush1.bf16.msra.mxu0 %v2849_v62  ;;  %v152_v6 = vshrl.u32 %v151_v4, 7 }
  0x36   :  { %1988 = vmatmul.mubr.msk.f32.vlgmr.msra.gmra.mrb[16].mxu1 %vm171_vm0, %v2762_v9  ;;  %2225 = vmatprep.subr.bf16.mxu0 %v2755_v7  ;;  %v2876_v9 = vpack.c.bf16 %v54_v13, %v50_v12 }
  0x37   :  { %2195 = vmatpush1.bf16.msra.mxu1 %v2855_v2  ;;  %1040 = vmatprep.mubr.f32.mxu1 %v2705_v0  ;;  %v153_v12 = vsub.s32 0, %v152_v6  ;;  %v157_v17 = vsub.s32 1, %v152_v6  ;;  %v161_v39 = vsub.s32 2, %v152_v6  ;;  %v165_v45 = vsub.s32 3, %v152_v6 }
  0x38   :  { %970 = vmatmul.mubr.f32.vlgmr.msra.gmra.mrb[2].mxu0 %v2705_v0  ;;  %2197 = vmatprep.subr.bf16.mxu1 %v2858_v3 }
  0x39   :  { %2227 = vmatpush1.bf16.msra.mxu0 %v2768_v14  ;;  %1139 = vmatprep.mubr.f32.mxu0 %v2705_v0  ;;  %v2955_v19 = vrot.slane %v97_v16, %v153_v12  ;;  %v2957_v22 = vrot.slane %v97_v16, %v157_v17  ;;  %v2961_v50 = vrot.slane %v97_v16, %v161_v39 }
  0x3a   :  { %2229 = vmatprep.subr.bf16.mxu0 %v2770_v15  ;;  %v2963_v55 = vrot.slane %v97_v16, %v165_v45 }
  0x3b   :  { %2199 = vmatpush1.bf16.msra.mxu1 %v2865_v8 }
  0x3c   :  { %2201 = vmatprep.subr.bf16.mxu1 %v2870_v11 }
  0x3d   :  { %2231 = vmatpush1.bf16.msra.mxu0 %v2777_v20 }
  0x3e   :  { %2233 = vmatprep.subr.bf16.mxu0 %v2781_v21 }
  0x3f   :  { %2203 = vmatpush1.bf16.msra.mxu1 %v2876_v9 }
  0x40   :  { %2205 = vmatprep.subr.bf16.mxu1 %v2879_v18 }
  0x41   :  { %2235 = vmatpush1.bf16.msra.mxu0 %v2791_v27 }
  0x42   :  { %2237 = vmatprep.subr.bf16.mxu0 %v2795_v28 }
  0x43   :  { %2207 = vmatpush1.bf16.msra.mxu1 %v2884_v25 }
  0x44   :  { %2209 = vmatprep.subr.bf16.mxu1 %v2887_v26 }
  0x45   :  { %2239 = vmatpush1.bf16.msra.mxu0 %v2801_v33 }
  0x46   :  { %2241 = vmatprep.subr.bf16.mxu0 %v2805_v34 }
  0x47   :  { %2211 = vmatpush1.bf16.msra.mxu1 %v2892_v35 }
  0x48   :  { %2213 = vmatprep.subr.bf16.mxu1 %v2895_v36 }
  0x49   :  { %2243 = vmatpush1.bf16.msra.mxu0 %v2814_v40 }
  0x4a   :  { %2245 = vmatprep.subr.bf16.mxu0 %v2818_v41 }
  0x4b   :  { %2215 = vmatpush1.bf16.msra.mxu1 %v2900_v43 }
  0x4c   :  { %2217 = vmatprep.subr.bf16.mxu1 %v2903_v44 }
  0x4d   :  { %2247 = vmatpush1.bf16.msra.mxu0 %v2824_v46 }
  0x4e   :  { %2249 = vmatprep.subr.bf16.mxu0 %v2828_v47 }
  0x4f   :  { %2219 = vmatpush1.bf16.msra.mxu1 %v2908_v51 }
  0x50   :  { %2221 = vmatprep.subr.bf16.mxu1 %v2911_v52 }
  0x51   :  { %2251 = vmatpush1.bf16.msra.mxu0 %v2837_v53 }
  0x52   :  { %2253 = vmatprep.subr.bf16.mxu0 %v2841_v56 }
  0x53   :  { %2223 = vmatpush1.bf16.msra.mxu1 %v2916_v57 }
  0x54   :  { %2257 = vmatprep.subr.bf16.mxu1 %v2846_v59 }
  0x55   :  { %2255 = vmatpush1.bf16.msra.mxu0 %v2849_v62 }
  0x56   :  { %1041 = vmatmul.mubr.f32.vlgmr.msra.gmra.mrb[2].mxu1 %v2705_v0  ;;  %2289 = vmatprep.subr.bf16.mxu0 %v2755_v7 }
  0x57   :  { %2259 = vmatpush1.bf16.msra.mxu1 %v2855_v2  ;;  %1210 = vmatprep.mubr.f32.mxu1 %v2705_v0 }
  0x58   :  { %2261 = vmatprep.subr.bf16.mxu1 %v2858_v3 }
  0x5b   :  { %2263 = vmatpush1.bf16.msra.mxu1 %v2865_v8 }
  0x5c   :  { %2265 = vmatprep.subr.bf16.mxu1 %v2870_v11 }
  0x5f   :  { %2267 = vmatpush1.bf16.msra.mxu1 %v2876_v9 }
  0x60   :  { %2269 = vmatprep.subr.bf16.mxu1 %v2879_v18 }
  0x63   :  { %2271 = vmatpush1.bf16.msra.mxu1 %v2884_v25 }
  0x64   :  { %2273 = vmatprep.subr.bf16.mxu1 %v2887_v26 }
  0x67   :  { %2275 = vmatpush1.bf16.msra.mxu1 %v2892_v35 }
  0x68   :  { %2277 = vmatprep.subr.bf16.mxu1 %v2895_v36 }
  0x6b   :  { %2279 = vmatpush1.bf16.msra.mxu1 %v2900_v43 }
  0x6c   :  { %2281 = vmatprep.subr.bf16.mxu1 %v2903_v44 }
  0x6f   :  { %2283 = vmatpush1.bf16.msra.mxu1 %v2908_v51 }
  0x70   :  { %2285 = vmatprep.subr.bf16.mxu1 %v2911_v52 }
  0x73   :  { %2287 = vmatpush1.bf16.msra.mxu1 %v2916_v57 }
  0x74   :  { %2321 = vmatprep.subr.bf16.mxu1 %v2846_v59 }
  0xe9   :  { %v241_v58 = vpop.f32.mrb[0].mxu1 }
  0xea   :  { %v243_v60 = vpop.f32.mrb[1].mxu1  ;;  %v242_v23 = vadd.f32 %v241_v58, %v2955_v19 }
  0xeb   :  { %v244_v24 = vadd.f32 %v243_v60, %v2957_v22 }
  0xf1   :  { %v2943_v61 = vpop.f32.mrb[4].mxu1 }
  0xf2   :  { %v2945_v63 = vpop.f32.mrb[5].mxu1 }
  0xf3   :  { %v391_v45 = vadd.f32 %v2945_v63, %v2957_v22 }
  0xf9   :  { %v2947_v1 = vpop.f32.mrb[8].mxu1 }
  0xfa   :  { %v2949_v5 = vpop.f32.mrb[9].mxu1 }
 0x101   :  { %v2951_v10 = vpop.f32.mrb[12].mxu1 }
 0x102   :  { %v2953_v13 = vpop.f32.mrb[13].mxu1 }
 0x10b   :  { %v971_v29 = vpop.f32.mrb[2].mxu0 }
 0x10c   :  { %v1047_v30 = vadd.f32 %v971_v29, %v242_v23  ;;  %v973_v31 = vpop.f32.mrb[3].mxu0 }
 0x10d   :  { %v1048_v32 = vadd.f32 %v973_v31, %v244_v24 }
 0x10e   :  { %v1989_v38 = vmul.f32 -1.442695, %v1047_v30 }
 0x10f   :  { %v1990_v37 = vmul.f32 -1.442695, %v1048_v32 }
 0x111   :  { %2598 = vpow2.f32 %v1990_v37 }
 0x112   :  { %2600 = vpow2.f32 %v1989_v38 }
 0x11b   :  { %v2599_v42 = vpop.eup %2598 }
 0x11c   :  { %v2601_v48 = vpop.eup %2600  ;;  %v1060_v49 = vadd.f32 1.0, %v2599_v42  ;;  %v389_v42 = vadd.f32 %v2943_v61, %v2955_v19 }
 0x11d   :  { %v1054_v54 = vadd.f32 1.0, %v2601_v48 }
 0x11e   :  { %2602 = vrcp.f32 %v1060_v49 }
 0x11f   :  { %2604 = vrcp.f32 %v1054_v54 }
 0x128   :  { %v2603_v23 = vpop.eup %2602 }
 0x129   :  { %v1042_v58 = vpop.f32.mrb[2].mxu1  ;;  %v2605_v6 = vpop.eup %2604  ;;  %v1070_v29 = vmul.f32 0.0, %v2603_v23 }
 0x12a   :  { %v2556_v60 = vadd.f32 %v1042_v58, %v2961_v50  ;;  %v1044_v4 = vpop.f32.mrb[3].mxu1 }
 0x12b   :  { %v2557_v12 = vadd.f32 %v1044_v4, %v2963_v55 }
 0x12c   :  { %2606 = vtanh.f32 %v2556_v60 }
 0x12d   :  { %v1991_v17 = vmul.f32 -1.442695, %v2557_v12 }
 0x12f   :  { %2608 = vpow2.f32 %v1991_v17 }
 0x136   :  { %v2607_v24 = vpop.eup %2606 }
 0x137   :  { %v1071_v30 = vmul.f32 %v2607_v24, %v2605_v6 }
 0x139   :  { %v2609_v31 = vpop.eup %2608  ;;  %v2967_v32 = vadd.f32 %v1071_v30, %v1070_v29 }
 0x13a   :  { %v1067_v16 = vadd.f32 1.0, %v2609_v31 }
 0x13b   :  { %2610 = vtanh.f32 %v2967_v32 }
 0x13c   :  { %2612 = vrcp.f32 %v1067_v16 }
 0x145   :  { %v2611_v37 = vpop.eup %2610 }
 0x146   :  { %v2613_v38 = vpop.eup %2612 }
 0x147   :  { %v1074_v39 = vmul.f32 %v2613_v38, %v2611_v37 }
 0x149   :  { %1140 = vmatmul.mubr.f32.vlgmr.msra.gmra.mrb[4].mxu0 %v1074_v39  ;;  %1211 = vmatmul.mubr.f32.vlgmr.msra.gmra.mrb[6].mxu1 %v1074_v39 }
 0x14a   :  { %2291 = vmatpush1.bf16.msra.mxu0 %v2768_v14  ;;  %2323 = vmatpush1.bf16.msra.mxu1 %v2855_v2 }
 0x14b   :  { %2293 = vmatprep.subr.bf16.mxu0 %v2770_v15  ;;  %2325 = vmatprep.subr.bf16.mxu1 %v2858_v3 }
 0x14c   :  { %1309 = vmatprep.mubr.f32.mxu0 %v2705_v0  ;;  %1380 = vmatprep.mubr.f32.mxu1 %v2705_v0 }
 0x14e   :  { %2295 = vmatpush1.bf16.msra.mxu0 %v2777_v20  ;;  %2327 = vmatpush1.bf16.msra.mxu1 %v2865_v8 }
 0x14f   :  { %2297 = vmatprep.subr.bf16.mxu0 %v2781_v21  ;;  %2329 = vmatprep.subr.bf16.mxu1 %v2870_v11 }
 0x152   :  { %2299 = vmatpush1.bf16.msra.mxu0 %v2791_v27  ;;  %2331 = vmatpush1.bf16.msra.mxu1 %v2876_v9 }
 0x153   :  { %2301 = vmatprep.subr.bf16.mxu0 %v2795_v28  ;;  %2333 = vmatprep.subr.bf16.mxu1 %v2879_v18 }
 0x156   :  { %2303 = vmatpush1.bf16.msra.mxu0 %v2801_v33  ;;  %2335 = vmatpush1.bf16.msra.mxu1 %v2884_v25 }
 0x157   :  { %2305 = vmatprep.subr.bf16.mxu0 %v2805_v34  ;;  %2337 = vmatprep.subr.bf16.mxu1 %v2887_v26 }
 0x15a   :  { %2307 = vmatpush1.bf16.msra.mxu0 %v2814_v40  ;;  %2339 = vmatpush1.bf16.msra.mxu1 %v2892_v35 }
 0x15b   :  { %2309 = vmatprep.subr.bf16.mxu0 %v2818_v41  ;;  %2341 = vmatprep.subr.bf16.mxu1 %v2895_v36 }
 0x15e   :  { %2311 = vmatpush1.bf16.msra.mxu0 %v2824_v46  ;;  %2343 = vmatpush1.bf16.msra.mxu1 %v2900_v43 }
 0x15f   :  { %2313 = vmatprep.subr.bf16.mxu0 %v2828_v47  ;;  %2345 = vmatprep.subr.bf16.mxu1 %v2903_v44 }
 0x162   :  { %2315 = vmatpush1.bf16.msra.mxu0 %v2837_v53  ;;  %2347 = vmatpush1.bf16.msra.mxu1 %v2908_v51 }
 0x163   :  { %2317 = vmatprep.subr.bf16.mxu0 %v2841_v56  ;;  %2349 = vmatprep.subr.bf16.mxu1 %v2911_v52 }
 0x166   :  { %2319 = vmatpush1.bf16.msra.mxu0 %v2849_v62  ;;  %2351 = vmatpush1.bf16.msra.mxu1 %v2916_v57 }
 0x167   :  { %2353 = vmatprep.subr.bf16.mxu0 %v2755_v7  ;;  %2385 = vmatprep.subr.bf16.mxu1 %v2846_v59 }
 0x21c   :  { %v1141_v48 = vpop.f32.mrb[4].mxu0  ;;  %v1212_v49 = vpop.f32.mrb[6].mxu1 }
 0x21d   :  { %v1217_v54 = vadd.f32 %v1141_v48, %v389_v42  ;;  %v1143_v58 = vpop.f32.mrb[5].mxu0  ;;  %v1214_v60 = vpop.f32.mrb[7].mxu1  ;;  %v2562_v24 = vadd.f32 %v1212_v49, %v2961_v50 }
 0x21e   :  { %v1218_v4 = vadd.f32 %v1143_v58, %v391_v45  ;;  %v2563_v23 = vadd.f32 %v1214_v60, %v2963_v55  ;;  %v538_v60 = vadd.f32 %v2949_v5, %v2957_v22 }
 0x21f   :  { %v1992_v12 = vmul.f32 -1.442695, %v1217_v54 }
 0x220   :  { %v1993_v17 = vmul.f32 -1.442695, %v1218_v4  ;;  %v1994_v6 = vmul.f32 -1.442695, %v2563_v23 }
 0x221   :  { %2614 = vpow2.f32 %v1992_v12 }
 0x222   :  { %2616 = vpow2.f32 %v1993_v17 }
 0x223   :  { %2618 = vpow2.f32 %v1994_v6 }
 0x224   :  { %2620 = vtanh.f32 %v2562_v24 }
 0x22b   :  { %v2615_v29 = vpop.eup %2614 }
 0x22c   :  { %v2617_v61 = vpop.eup %2616  ;;  %v1224_v30 = vadd.f32 1.0, %v2615_v29 }
 0x22d   :  { %v1230_v63 = vadd.f32 1.0, %v2617_v61  ;;  %v2619_v31 = vpop.eup %2618 }
 0x22e   :  { %2622 = vrcp.f32 %v1224_v30  ;;  %v2621_v16 = vpop.eup %2620  ;;  %v1237_v42 = vadd.f32 1.0, %v2619_v31 }
 0x22f   :  { %2624 = vrcp.f32 %v1230_v63 }
 0x230   :  { %2626 = vrcp.f32 %v1237_v42 }
 0x238   :  { %v2623_v37 = vpop.eup %2622 }
 0x239   :  { %v2625_v38 = vpop.eup %2624  ;;  %v1241_v39 = vmul.f32 %v2623_v37, %v2621_v16 }
 0x23a   :  { %v1240_v45 = vmul.f32 %v2625_v38, %v2967_v32  ;;  %v2627_v49 = vpop.eup %2626  ;;  %v536_v32 = vadd.f32 %v2947_v1, %v2955_v19 }
 0x23c   :  { %v3011_v48 = vadd.f32 %v1241_v39, %v1240_v45 }
 0x23e   :  { %2628 = vtanh.f32 %v3011_v48 }
 0x248   :  { %v2629_v54 = vpop.eup %2628 }
 0x249   :  { %v1244_v58 = vmul.f32 %v2629_v54, %v2627_v49 }
 0x24b   :  { %1310 = vmatmul.mubr.f32.vlgmr.msra.gmra.mrb[6].mxu0 %v1244_v58  ;;  %1381 = vmatmul.mubr.f32.vlgmr.msra.gmra.mrb[10].mxu1 %v1244_v58 }
 0x24c   :  { %2355 = vmatpush1.bf16.msra.mxu0 %v2768_v14  ;;  %2387 = vmatpush1.bf16.msra.mxu1 %v2855_v2 }
 0x24d   :  { %2357 = vmatprep.subr.bf16.mxu0 %v2770_v15  ;;  %2389 = vmatprep.subr.bf16.mxu1 %v2858_v3 }
 0x24e   :  { %1479 = vmatprep.mubr.f32.mxu0 %v2705_v0  ;;  %1550 = vmatprep.mubr.f32.mxu1 %v2705_v0 }
 0x250   :  { %2359 = vmatpush1.bf16.msra.mxu0 %v2777_v20  ;;  %2391 = vmatpush1.bf16.msra.mxu1 %v2865_v8 }
 0x251   :  { %2361 = vmatprep.subr.bf16.mxu0 %v2781_v21  ;;  %2393 = vmatprep.subr.bf16.mxu1 %v2870_v11 }
 0x254   :  { %2363 = vmatpush1.bf16.msra.mxu0 %v2791_v27  ;;  %2395 = vmatpush1.bf16.msra.mxu1 %v2876_v9 }
 0x255   :  { %2365 = vmatprep.subr.bf16.mxu0 %v2795_v28  ;;  %2397 = vmatprep.subr.bf16.mxu1 %v2879_v18 }
 0x258   :  { %2367 = vmatpush1.bf16.msra.mxu0 %v2801_v33  ;;  %2399 = vmatpush1.bf16.msra.mxu1 %v2884_v25 }
 0x259   :  { %2369 = vmatprep.subr.bf16.mxu0 %v2805_v34  ;;  %2401 = vmatprep.subr.bf16.mxu1 %v2887_v26 }
 0x25c   :  { %2371 = vmatpush1.bf16.msra.mxu0 %v2814_v40  ;;  %2403 = vmatpush1.bf16.msra.mxu1 %v2892_v35 }
 0x25d   :  { %2373 = vmatprep.subr.bf16.mxu0 %v2818_v41  ;;  %2405 = vmatprep.subr.bf16.mxu1 %v2895_v36 }
 0x260   :  { %2375 = vmatpush1.bf16.msra.mxu0 %v2824_v46  ;;  %2407 = vmatpush1.bf16.msra.mxu1 %v2900_v43 }
 0x261   :  { %2377 = vmatprep.subr.bf16.mxu0 %v2828_v47  ;;  %2409 = vmatprep.subr.bf16.mxu1 %v2903_v44 }
 0x264   :  { %2379 = vmatpush1.bf16.msra.mxu0 %v2837_v53  ;;  %2411 = vmatpush1.bf16.msra.mxu1 %v2908_v51 }
 0x265   :  { %2381 = vmatprep.subr.bf16.mxu0 %v2841_v56  ;;  %2413 = vmatprep.subr.bf16.mxu1 %v2911_v52 }
 0x268   :  { %2383 = vmatpush1.bf16.msra.mxu0 %v2849_v62  ;;  %2415 = vmatpush1.bf16.msra.mxu1 %v2916_v57 }
 0x269   :  { %2417 = vmatprep.subr.bf16.mxu0 %v2755_v7  ;;  %2449 = vmatprep.subr.bf16.mxu1 %v2846_v59 }
 0x31e   :  { %v1311_v4 = vpop.f32.mrb[6].mxu0  ;;  %v1382_v12 = vpop.f32.mrb[10].mxu1 }
 0x31f   :  { %v1387_v17 = vadd.f32 %v1311_v4, %v536_v32  ;;  %v1313_v23 = vpop.f32.mrb[7].mxu0  ;;  %v1384_v6 = vpop.f32.mrb[11].mxu1  ;;  %v2568_v59 = vadd.f32 %v1382_v12, %v2961_v50  ;;  %v101_v4 = vld [vmem:[#allocation2 + $0x2a0] sm:$0xff] }
 0x320   :  { %v1388_v24 = vadd.f32 %v1313_v23, %v538_v60  ;;  %v2569_v7 = vadd.f32 %v1384_v6, %v2963_v55  ;;  %v103_v23 = vld [vmem:[#allocation2 + $0x2e0] sm:$0xff] }
 0x321   :  { %v1995_v29 = vmul.f32 -1.442695, %v1387_v17  ;;  %v102_v17 = vld [vmem:[#allocation2 + $0x2c0] sm:$0xff] }
 0x322   :  { %v1996_v61 = vmul.f32 -1.442695, %v1388_v24  ;;  %v1997_v30 = vmul.f32 -1.442695, %v2569_v7  ;;  %v2487_v6 = vpack.c.bf16 %v103_v23, %v102_v17  ;;  %v104_v24 = vld [vmem:[#allocation2 + $0x300] sm:$0xff] }
 0x323   :  { %2630 = vpow2.f32 %v1995_v29  ;;  %v105_v29 = vld [vmem:[#allocation2 + $0x320] sm:$0xff] }
 0x324   :  { %2632 = vpow2.f32 %v1996_v61  ;;  %v2490_v61 = vpack.c.bf16 %v105_v29, %v104_v24  ;;  %v106_v7 = vld [vmem:[#allocation2 + $0x340] sm:$0xff] }
 0x325   :  { %2634 = vpow2.f32 %v1997_v30  ;;  %v107_v30 = vld [vmem:[#allocation2 + $0x360] sm:$0xff] }
 0x326   :  { %2636 = vtanh.f32 %v2568_v59  ;;  %v2493_v59 = vpack.c.bf16 %v107_v30, %v106_v7  ;;  %v1755_v24 = vld [vmem:[%s3142_s1] sm:$0xff]  ;;  %v128_v7 = vld [vmem:[#allocation2 + $0x408] sm:$0xff] }
 0x327   :  { %v129_v30 = vld [vmem:[#allocation2 + $0x428] sm:$0xff] }
 0x32d   :  { %v2631_v63 = vpop.eup %2630 }
 0x32e   :  { %v2633_v1 = vpop.eup %2632  ;;  %v1394_v31 = vadd.f32 1.0, %v2631_v63  ;;  %v108_v63 = vld [vmem:[#allocation2 + $0x380] sm:$0xff] }
 0x32f   :  { %v1400_v5 = vadd.f32 1.0, %v2633_v1  ;;  %v2635_v16 = vpop.eup %2634  ;;  %v109_v1 = vld [vmem:[#allocation2 + $0x3a0] sm:$0xff] }
 0x330   :  { %2638 = vrcp.f32 %v1394_v31  ;;  %v2637_v37 = vpop.eup %2636  ;;  %v1407_v45 = vadd.f32 1.0, %v2635_v16  ;;  %v2496_v31 = vpack.c.bf16 %v109_v1, %v108_v63  ;;  %v111_v16 = vld [vmem:[#allocation2 + $0x3e0] sm:$0xff]  ;;  %v131_v63 = vld [vmem:[#allocation2 + $0x270] sm:$0xff] }
 0x331   :  { %2640 = vrcp.f32 %v1400_v5  ;;  %v110_v5 = vld [vmem:[#allocation2 + $0x3c0] sm:$0xff]  ;;  %v132_v1 = vld [vmem:[#allocation2 + $0x290] sm:$0xff] }
 0x332   :  { %2642 = vrcp.f32 %v1407_v45  ;;  %v114_v45 = vld [vmem:[#allocation2 + $0x248] sm:$0xff] }
 0x33a   :  { %v2639_v38 = vpop.eup %2638 }
 0x33b   :  { %v2641_v39 = vpop.eup %2640  ;;  %v1411_v42 = vmul.f32 %v2639_v38, %v2637_v37  ;;  %v2499_v37 = vpack.c.bf16 %v111_v16, %v110_v5  ;;  %v112_v38 = vld [vmem:[#allocation2 + $0x400] sm:$0xff]  ;;  %v133_v5 = vld [vmem:[#allocation2 + $0x2b0] sm:$0xff] }
 0x33c   :  { %v1410_v49 = vmul.f32 %v2641_v39, %v3011_v48  ;;  %v2643_v58 = vpop.eup %2642  ;;  %v100_v48 = vld [vmem:[#allocation2 + $0x280] sm:$0xff]  ;;  %v2532_v16 = vpack.c.bf16 %v133_v5, %v132_v1 }
 0x33d   :  { %v2484_v12 = vpack.c.bf16 %v101_v4, %v100_v48  ;;  %v113_v39 = vld [vmem:[#allocation2 + $0x420] sm:$0xff] }
 0x33e   :  { %v3055_v54 = vadd.f32 %v1411_v42, %v1410_v49  ;;  %v2502_v42 = vpack.c.bf16 %v113_v39, %v112_v38  ;;  %v115_v49 = vld [vmem:[#allocation2 + $0x268] sm:$0xff]  ;;  %v135_v38 = vld [vmem:[#allocation2 + $0x2f0] sm:$0xff] }
 0x340   :  { %2644 = vtanh.f32 %v3055_v54 }
 0x34a   :  { %v2645_v32 = vpop.eup %2644 }
 0x34b   :  { %v1414_v60 = vmul.f32 %v2645_v32, %v2643_v58  ;;  %v2505_v58 = vpack.c.bf16 %v115_v49, %v114_v45  ;;  %v117_v32 = vld [vmem:[#allocation2 + $0x2a8] sm:$0xff]  ;;  %v138_v49 = vld [vmem:[#allocation2 + $0x350] sm:$0xff] }
 0x34d   :  { %1480 = vmatmul.mubr.f32.vlgmr.msra.gmra.mrb[8].mxu0 %v1414_v60  ;;  %1551 = vmatmul.mubr.f32.vlgmr.msra.gmra.mrb[14].mxu1 %v1414_v60 }
 0x34e   :  { %2419 = vmatpush1.bf16.msra.mxu0 %v2768_v14  ;;  %2451 = vmatpush1.bf16.msra.mxu1 %v2855_v2  ;;  %v683_v14 = vadd.f32 %v2951_v10, %v2955_v19 }
 0x34f   :  { %2421 = vmatprep.subr.bf16.mxu0 %v2770_v15  ;;  %2453 = vmatprep.subr.bf16.mxu1 %v2858_v3  ;;  %v685_v15 = vadd.f32 %v2953_v13, %v2957_v22  ;;  %v2706_v13 = vmov 0.0|0.0  }
 0x350   :  { %1649 = vmatprep.mubr.f32.mxu0 %v2705_v0  ;;  %1720 = vmatprep.mubr.f32.mxu1 %v2705_v0 }
 0x352   :  { %2423 = vmatpush1.bf16.msra.mxu0 %v2777_v20  ;;  %2455 = vmatpush1.bf16.msra.mxu1 %v2865_v8 }
 0x353   :  { %2425 = vmatprep.subr.bf16.mxu0 %v2781_v21  ;;  %2457 = vmatprep.subr.bf16.mxu1 %v2870_v11 }
 0x356   :  { %2427 = vmatpush1.bf16.msra.mxu0 %v2791_v27  ;;  %2459 = vmatpush1.bf16.msra.mxu1 %v2876_v9 }
 0x357   :  { %2429 = vmatprep.subr.bf16.mxu0 %v2795_v28  ;;  %2461 = vmatprep.subr.bf16.mxu1 %v2879_v18 }
 0x35a   :  { %2431 = vmatpush1.bf16.msra.mxu0 %v2801_v33  ;;  %2463 = vmatpush1.bf16.msra.mxu1 %v2884_v25 }
 0x35b   :  { %2433 = vmatprep.subr.bf16.mxu0 %v2805_v34  ;;  %2465 = vmatprep.subr.bf16.mxu1 %v2887_v26 }
 0x35e   :  { %2435 = vmatpush1.bf16.msra.mxu0 %v2814_v40  ;;  %2467 = vmatpush1.bf16.msra.mxu1 %v2892_v35 }
 0x35f   :  { %2437 = vmatprep.subr.bf16.mxu0 %v2818_v41  ;;  %2469 = vmatprep.subr.bf16.mxu1 %v2895_v36 }
 0x362   :  { %2439 = vmatpush1.bf16.msra.mxu0 %v2824_v46  ;;  %2471 = vmatpush1.bf16.msra.mxu1 %v2900_v43 }
 0x363   :  { %2441 = vmatprep.subr.bf16.mxu0 %v2828_v47  ;;  %2473 = vmatprep.subr.bf16.mxu1 %v2903_v44 }
 0x366   :  { %2443 = vmatpush1.bf16.msra.mxu0 %v2837_v53  ;;  %2475 = vmatpush1.bf16.msra.mxu1 %v2908_v51 }
 0x367   :  { %2445 = vmatprep.subr.bf16.mxu0 %v2841_v56  ;;  %2477 = vmatprep.subr.bf16.mxu1 %v2911_v52  ;;  %v98_v52 = vld [vmem:[#allocation2 + $0x240] sm:$0xff] }
 0x36a   :  { %2447 = vmatpush1.bf16.msra.mxu0 %v2849_v62  ;;  %2479 = vmatpush1.bf16.msra.mxu1 %v2916_v57  ;;  %v99_v57 = vld [vmem:[#allocation2 + $0x260] sm:$0xff] }
 0x36b   :  { %v2481_v10 = vpack.c.bf16 %v99_v57, %v98_v52  ;;  %2480 = vmatprep.subr.bf16.mxu0 %v2706_v13  ;;  %2504 = vmatprep.subr.bf16.mxu1 %v2706_v13 }
 0x420   :  { %v1481_v20 = vpop.f32.mrb[8].mxu0  ;;  %v1552_v21 = vpop.f32.mrb[14].mxu1 }
 0x421   :  { %v1557_v27 = vadd.f32 %v1481_v20, %v683_v14  ;;  %v1483_v28 = vpop.f32.mrb[9].mxu0  ;;  %v1554_v33 = vpop.f32.mrb[15].mxu1  ;;  %v2574_v53 = vadd.f32 %v1552_v21, %v2961_v50  ;;  %v118_v14 = vld [vmem:[#allocation2 + $0x2c8] sm:$0xff] }
 0x422   :  { %v1558_v34 = vadd.f32 %v1483_v28, %v685_v15  ;;  %v2575_v46 = vadd.f32 %v1554_v33, %v2963_v55  ;;  %v119_v15 = vld [vmem:[#allocation2 + $0x2e8] sm:$0xff] }
 0x423   :  { %v1998_v40 = vmul.f32 -1.442695, %v1557_v27  ;;  %v2511_v20 = vpack.c.bf16 %v119_v15, %v118_v14  ;;  %v120_v21 = vld [vmem:[#allocation2 + $0x308] sm:$0xff]  ;;  %v142_v15 = vld [vmem:[#allocation2 + $0x3d0] sm:$0xff] }
 0x424   :  { %v1999_v41 = vmul.f32 -1.442695, %v1558_v34  ;;  %v2000_v47 = vmul.f32 -1.442695, %v2575_v46  ;;  %v121_v27 = vld [vmem:[#allocation2 + $0x328] sm:$0xff] }
 0x425   :  { %2646 = vpow2.f32 %v1998_v40  ;;  %v2514_v28 = vpack.c.bf16 %v121_v27, %v120_v21  ;;  %v122_v33 = vld [vmem:[#allocation2 + $0x348] sm:$0xff]  ;;  %v146_v27 = vld [vmem:[#allocation2 + $0x440] ss:$0 sm:$0xff] }
 0x426   :  { %2648 = vpow2.f32 %v1999_v41  ;;  %v123_v34 = vld [vmem:[#allocation2 + $0x368] sm:$0xff] }
 0x427   :  { %2650 = vpow2.f32 %v2000_v47  ;;  %v2517_v40 = vpack.c.bf16 %v123_v34, %v122_v33  ;;  %v124_v41 = vld [vmem:[#allocation2 + $0x388] sm:$0xff] }
 0x428   :  { %2652 = vtanh.f32 %v2574_v53  ;;  %v125_v46 = vld [vmem:[#allocation2 + $0x3a8] sm:$0xff] }
 0x429   :  { %v2520_v47 = vpack.c.bf16 %v125_v46, %v124_v41  ;;  %v126_v53 = vld [vmem:[#allocation2 + $0x3c8] sm:$0xff]  ;;  %v144_v41 = vld [vmem:[#allocation2 + $0x410] sm:$0xff] }
 0x42a   :  { %v145_v46 = vld [vmem:[#allocation2 + $0x430] sm:$0xff] }
 0x42f   :  { %v2647_v56 = vpop.eup %2646 }
 0x430   :  { %v2649_v62 = vpop.eup %2648  ;;  %v1564_v2 = vadd.f32 1.0, %v2647_v56  ;;  %v127_v56 = vld [vmem:[#allocation2 + $0x3e8] sm:$0xff] }
 0x431   :  { %v1570_v3 = vadd.f32 1.0, %v2649_v62  ;;  %v2651_v8 = vpop.eup %2650  ;;  %v2523_v62 = vpack.c.bf16 %v127_v56, %v126_v53  ;;  %v147_v53 = vld [vmem:[#allocation2 + $0x448] ss:$0 sm:$0xff] }
 0x432   :  { %2654 = vrcp.f32 %v1564_v2  ;;  %v2653_v11 = vpop.eup %2652  ;;  %v1577_v26 = vadd.f32 1.0, %v2651_v8 }
 0x433   :  { %2656 = vrcp.f32 %v1570_v3 }
 0x434   :  { %2658 = vrcp.f32 %v1577_v26 }
 0x43c   :  { %v2655_v9 = vpop.eup %2654 }
 0x43d   :  { %v2657_v18 = vpop.eup %2656  ;;  %v1581_v25 = vmul.f32 %v2655_v9, %v2653_v11 }
 0x43e   :  { %v1580_v35 = vmul.f32 %v2657_v18, %v3055_v54  ;;  %v2659_v43 = vpop.eup %2658  ;;  %v116_v54 = vld [vmem:[#allocation2 + $0x288] sm:$0xff] }
 0x43f   :  { %v2508_v60 = vpack.c.bf16 %v117_v32, %v116_v54  ;;  %v139_v54 = vld [vmem:[#allocation2 + $0x370] sm:$0xff] }
 0x440   :  { %v3097_v36 = vadd.f32 %v1581_v25, %v1580_v35  ;;  %v140_v32 = vld [vmem:[#allocation2 + $0x390] sm:$0xff] }
 0x442   :  { %2660 = vtanh.f32 %v3097_v36 }
 0x44c   :  { %v2661_v44 = vpop.eup %2660 }
 0x44d   :  { %v1584_v51 = vmul.f32 %v2661_v44, %v2659_v43 }
 0x44f   :  { %1650 = vmatmul.mubr.f32.vlgmr.msra.gmra.mrb[0].mxu0 %v1584_v51  ;;  %1721 = vmatmul.mubr.f32.vlgmr.msra.gmra.mrb[16].mxu1 %v1584_v51 }
 0x450   :  { %2482 = vmatpush3.bf16.msra.mxu0 %v2481_v10  ;;  %2087 = vmatprep.mubr.msk.f32.mxu0 %vm2707_vm1, %v2705_v0 }
 0x451   :  { %2483 = vmatprep.subr.bf16.mxu0 %v2706_v13  ;;  %2122 = vmatprep.mubr.msk.f32.mxu1 %vm2707_vm1, %v2705_v0 }
 0x452   :  { %2506 = vmatpush3.bf16.msra.mxu1 %v2505_v58  ;;  %v2541_v58 = vpack.c.bf16 %v139_v54, %v138_v49 }
 0x453   :  { %2507 = vmatprep.subr.bf16.mxu1 %v2706_v13 }
 0x454   :  { %2485 = vmatpush3.bf16.msra.mxu0 %v2484_v12 }
 0x455   :  { %2486 = vmatprep.subr.bf16.mxu0 %v2706_v13 }
 0x456   :  { %2509 = vmatpush3.bf16.msra.mxu1 %v2508_v60  ;;  %v141_v60 = vld [vmem:[#allocation2 + $0x3b0] sm:$0xff] }
 0x457   :  { %2510 = vmatprep.subr.bf16.mxu1 %v2706_v13  ;;  %v2544_v14 = vpack.c.bf16 %v141_v60, %v140_v32 }
 0x458   :  { %2488 = vmatpush3.bf16.msra.mxu0 %v2487_v6 }
 0x459   :  { %2489 = vmatprep.subr.bf16.mxu0 %v2706_v13 }
 0x45a   :  { %2512 = vmatpush3.bf16.msra.mxu1 %v2511_v20  ;;  %v143_v20 = vld [vmem:[#allocation2 + $0x3f0] sm:$0xff] }
 0x45b   :  { %2513 = vmatprep.subr.bf16.mxu1 %v2706_v13  ;;  %v2547_v21 = vpack.c.bf16 %v143_v20, %v142_v15 }
 0x45c   :  { %2491 = vmatpush3.bf16.msra.mxu0 %v2490_v61 }
 0x45d   :  { %2492 = vmatprep.subr.bf16.mxu0 %v2706_v13 }
 0x45e   :  { %2515 = vmatpush3.bf16.msra.mxu1 %v2514_v28 }
 0x45f   :  { %2516 = vmatprep.subr.bf16.mxu1 %v2706_v13 }
 0x460   :  { %2494 = vmatpush3.bf16.msra.mxu0 %v2493_v59  ;;  %v2526_v59 = vpack.c.bf16 %v129_v30, %v128_v7 }
 0x461   :  { %2495 = vmatprep.subr.bf16.mxu0 %v2706_v13 }
 0x462   :  { %2518 = vmatpush3.bf16.msra.mxu1 %v2517_v40 }
 0x463   :  { %2519 = vmatprep.subr.bf16.mxu1 %v2706_v13 }
 0x464   :  { %2497 = vmatpush3.bf16.msra.mxu0 %v2496_v31 }
 0x465   :  { %2498 = vmatprep.subr.bf16.mxu0 %v2706_v13 }
 0x466   :  { %2521 = vmatpush3.bf16.msra.mxu1 %v2520_v47  ;;  %v2550_v47 = vpack.c.bf16 %v145_v46, %v144_v41 }
 0x467   :  { %2522 = vmatprep.subr.bf16.mxu1 %v2706_v13 }
 0x468   :  { %2500 = vmatpush3.bf16.msra.mxu0 %v2499_v37  ;;  %v134_v37 = vld [vmem:[#allocation2 + $0x2d0] sm:$0xff] }
 0x469   :  { %2501 = vmatprep.subr.bf16.mxu0 %v2706_v13  ;;  %v2535_v39 = vpack.c.bf16 %v135_v38, %v134_v37 }
 0x46a   :  { %2524 = vmatpush3.bf16.msra.mxu1 %v2523_v62 }
 0x46b   :  { %2525 = vmatprep.subr.bf16.mxu1 %v2706_v13 }
 0x46c   :  { %2503 = vmatpush3.bf16.msra.mxu0 %v2502_v42  ;;  %v137_v42 = vld [vmem:[#allocation2 + $0x330] sm:$0xff] }
 0x46d   :  { %2528 = vmatprep.subr.bf16.mxu0 %v2706_v13 }
 0x46e   :  { %2527 = vmatpush3.bf16.msra.mxu1 %v2526_v59 }
 0x522   :  { %v1651_v2 = vpop.f32.mrb[0].mxu0  ;;  %v1722_v3 = vpop.f32.mrb[16].mxu1 }
 0x523   :  { %v2576_v8 = vadd.f32 %v1651_v2, %v2955_v19  ;;  %v1653_v11 = vpop.f32.mrb[1].mxu0  ;;  %v1724_v9 = vpop.f32.mrb[17].mxu1  ;;  %v2578_v44 = vadd.f32 %v1722_v3, %v2961_v50 }
 0x524   :  { %v2577_v18 = vadd.f32 %v1653_v11, %v2957_v22  ;;  %v2579_v35 = vadd.f32 %v1724_v9, %v2963_v55 }
 0x525   :  { %v2001_v25 = vmul.f32 -1.442695, %v2576_v8  ;;  %v148_v8 = vld [vmem:[#allocation2 + $0x450] ss:$0 sm:$0xff] }
 0x526   :  { %v2002_v26 = vmul.f32 -1.442695, %v2577_v18  ;;  %v2003_v43 = vmul.f32 -1.442695, %v2579_v35 }
 0x527   :  { %2662 = vpow2.f32 %v2001_v25 }
 0x528   :  { %2664 = vpow2.f32 %v2002_v26 }
 0x529   :  { %2666 = vpow2.f32 %v2003_v43 }
 0x52a   :  { %2668 = vtanh.f32 %v2578_v44 }
 0x531   :  { %v2663_v51 = vpop.eup %2662 }
 0x532   :  { %v2665_v52 = vpop.eup %2664  ;;  %v1734_v57 = vadd.f32 1.0, %v2663_v51 }
 0x533   :  { %v1740_v10 = vadd.f32 1.0, %v2665_v52  ;;  %v2667_v19 = vpop.eup %2666 }
 0x534   :  { %2670 = vrcp.f32 %v1734_v57  ;;  %v2669_v48 = vpop.eup %2668  ;;  %v1747_v17 = vadd.f32 1.0, %v2667_v19 }
 0x535   :  { %2672 = vrcp.f32 %v1740_v10 }
 0x536   :  { %2674 = vrcp.f32 %v1747_v17 }
 0x53e   :  { %v2671_v22 = vpop.eup %2670 }
 0x53f   :  { %v2673_v4 = vpop.eup %2672  ;;  %v1751_v12 = vmul.f32 %v2671_v22, %v2669_v48 }
 0x540   :  { %v1750_v23 = vmul.f32 %v2673_v4, %v3097_v36  ;;  %v2675_v50 = vpop.eup %2674  ;;  %v130_v36 = vld [vmem:[#allocation2 + $0x250] sm:$0xff] }
 0x541   :  { %v2529_v31 = vpack.c.bf16 %v131_v63, %v130_v36 }
 0x542   :  { %v1752_v55 = vadd.f32 %v1751_v12, %v1750_v23 }
 0x544   :  { %2676 = vtanh.f32 %v1752_v55 }
 0x54e   :  { %v2677_v6 = vpop.eup %2676 }
 0x54f   :  { %v1754_v29 = vmul.f32 %v2677_v6, %v2675_v50 }
 0x551   :  { %v1756_v61 = vadd.f32 %v1755_v24, %v1754_v29 }
 0x553   :  { %2088 = vmatmul.mubr.f32.vlgmr.msra.gmra.mrb[10].mxu0 %v1756_v61 }
 0x554   :  { %2157 = vmatprep.mubr.msk.f32.mxu0 %vm2707_vm1, %v2705_v0  ;;  %2530 = vmatpush3.bf16.msra.mxu0 %v2529_v31  ;;  %v136_v0 = vld [vmem:[#allocation2 + $0x310] sm:$0xff] }
 0x555   :  { %2531 = vmatprep.subr.bf16.mxu0 %v2706_v13  ;;  %v2538_v45 = vpack.c.bf16 %v137_v42, %v136_v0 }
 0x558   :  { %2533 = vmatpush3.bf16.msra.mxu0 %v2532_v16 }
 0x559   :  { %2534 = vmatprep.subr.bf16.mxu0 %v2706_v13 }
 0x55c   :  { %2536 = vmatpush3.bf16.msra.mxu0 %v2535_v39 }
 0x55d   :  { %2537 = vmatprep.subr.bf16.mxu0 %v2706_v13 }
 0x560   :  { %2539 = vmatpush3.bf16.msra.mxu0 %v2538_v45 }
 0x561   :  { %2540 = vmatprep.subr.bf16.mxu0 %v2706_v13 }
 0x564   :  { %2542 = vmatpush3.bf16.msra.mxu0 %v2541_v58 }
 0x565   :  { %2543 = vmatprep.subr.bf16.mxu0 %v2706_v13 }
 0x568   :  { %2545 = vmatpush3.bf16.msra.mxu0 %v2544_v14 }
 0x569   :  { %2546 = vmatprep.subr.bf16.mxu0 %v2706_v13 }
 0x56c   :  { %2548 = vmatpush3.bf16.msra.mxu0 %v2547_v21 }
 0x56d   :  { %2549 = vmatprep.subr.bf16.mxu0 %v2706_v13 }
 0x570   :  { %2551 = vmatpush3.bf16.msra.mxu0 %v2550_v47 }
 0x626   :  { %v1823_v28 = vpop.f32.mrb[10].mxu0 }
 0x627   :  { %v1824_v33 = vadd.f32 %v1823_v28, %v146_v27  ;;  %v2089_v34 = vpop.f32.mrb[11].mxu0 }
 0x629   :  { %v1827_v40 = vmax.f32 %v1824_v33, 0.0 }
 0x62b   :  { %2123 = vmatmul.mubr.f32.vlgmr.msra.gmra.mrb[18].mxu1 %v1827_v40 }
 0x6fe   :  { %v1894_v56 = vpop.f32.mrb[18].mxu1 }
 0x6ff   :  { %v1895_v62 = vadd.f32 %v1894_v56, %v147_v53  ;;  %v2124_v2 = vpop.f32.mrb[19].mxu1 }
 0x701   :  { %v1898_v3 = vmax.f32 %v1895_v62, 0.0 }
 0x703   :  { %2158 = vmatmul.mubr.f32.vlgmr.msra.gmra.mrb[12].mxu0 %v1898_v3 }
 0x7d6   :  { %v1965_v11 = vpop.f32.mrb[12].mxu0 }
 0x7d7   :  { %v1966_v9 = vadd.f32 %v1965_v11, %v148_v8  ;;  %v2159_v13 = vpop.f32.mrb[13].mxu0 }
 0x7d9   :  { %1969 = vst [vmem:[%s3144_s3] sm:$0xff] %v1966_v9 }
 0x7da   :  { %1974 = vsyncpa [#allocation3], 1 }

</bundles_post_ra>
